<compile_context>
chip_gen: v7x
topology: tpu7x:2x2x1
jax: 0.10.0
libtpu: 0.0.40
codegen_flags: <defaults>
</compile_context>

<pallas_src>
import functools
import math

import jax
import jax.numpy as jnp
from jax.experimental import pallas as pl
from jax.experimental.pallas import tpu as pltpu


def _round_up(v, m):
    return ((v + m - 1) // m) * m


def _pad2d(x, rows, cols):
    r, c = x.shape
    return jnp.pad(x, ((0, rows - r), (0, cols - c)))


def _vmem_limit_bytes():
    """Per-generation VMEM limit: ~3/4 of physical, capped at 100 MiB (v5e/v6e 128 MiB, v7x 64 MiB)."""
    try:
        cap = int(pltpu.get_tpu_info().vmem_capacity_bytes)
    except Exception:
        cap = 64 * 1024 * 1024
    return min((cap * 3) // 4, 100 * 1024 * 1024)


# --------------------------------- kernels ----------------------------------

def _sage_layer1_kernel(tm, mask_ref, invd_ref, xagg_ref, w1l_ref, w1r_ref,
                        b1_ref, w2l_ref, h_ref, z_ref):
    """Row tile of:  h = relu(mean_agg(x) @ W1l + x @ W1r + b1);  z = h @ W2l."""
    # Exact mean aggregation: bf16 0/1 edge-count mask on the MXU, f32 1/deg scale on the VPU.
    agg = invd_ref[...] * jnp.dot(mask_ref[...], xagg_ref[...],
                                  preferred_element_type=jnp.float32)
    # Root rows sliced from the already-resident bf16 x block (no duplicate f32 HBM stream).
    row0 = pl.multiple_of(pl.program_id(0) * tm, tm)
    x_root = xagg_ref[pl.ds(row0, tm), :]
    # Two bf16 MXU dots with f32 accumulation (no concat copy through the store slot).
    h = (jnp.dot(agg.astype(jnp.bfloat16), w1l_ref[...],
                 preferred_element_type=jnp.float32)
         + jnp.dot(x_root, w1r_ref[...], preferred_element_type=jnp.float32)
         + b1_ref[...])
    h = jnp.maximum(h, 0.0)                                   # ReLU
    # TODO(synk): F.dropout(training=self.training) modeled in inference mode (identity).
    h_bf16 = h.astype(jnp.bfloat16)
    h_ref[...] = h_bf16
    # Reassociation pre-transform for layer 2 so layer 2 aggregates A @ (h @ W2l)
    # over the (smaller) class dim instead of (A @ h) @ W2l over the hidden dim.
    z_ref[...] = jnp.dot(h_bf16, w2l_ref[...],
                         preferred_element_type=jnp.float32).astype(z_ref.dtype)


def _sage_layer2_kernel(n_classes, mask_ref, invd_ref, zagg_ref, hroot_ref,
                        w2r_ref, b2_ref, o_ref):
    """Row tile of:  y = mean_agg(h @ W2l) + h @ W2r + b2;  out = log_softmax(y)."""
    agg = invd_ref[...] * jnp.dot(mask_ref[...], zagg_ref[...],
                                  preferred_element_type=jnp.float32)
    y = (agg
         + jnp.dot(hroot_ref[...], w2r_ref[...], preferred_element_type=jnp.float32)
         + b2_ref[...])
    # Mask padded class columns so they do not perturb the max / lse.
    col = jax.lax.broadcasted_iota(jnp.int32, y.shape, 1)
    y = jnp.where(col < n_classes, y, -1e30)
    m = jnp.max(y, axis=-1, keepdims=True)
    s = y - m
    lse = jnp.log(jnp.sum(jnp.exp(s), axis=-1, keepdims=True))
    o_ref[...] = s - lse


# --------------------------------- wrapper ----------------------------------

def _dense_mean_adjacency(edge_index, num_nodes):
    """Dense edge-count mask (duplicate-edge aware) + 1/deg column; messages flow src -> dst."""
    src, dst = edge_index[0], edge_index[1]
    counts = jnp.zeros((num_nodes, num_nodes), jnp.float32).at[dst, src].add(1.0)
    deg = jnp.sum(counts, axis=1, keepdims=True)
    return counts, 1.0 / jnp.maximum(deg, 1.0)


def prepare_graph(edge_index, num_nodes):
    """Hoisted O(N^2) graph preprocessing; cache the result for a static graph."""
    n_pad = _round_up(num_nodes, 128)
    counts, inv_deg = _dense_mean_adjacency(edge_index, num_nodes)
    # bf16 represents integers exactly up to 256 -> edge-count mask stays exact for normal graphs.
    assert float(jnp.max(counts)) <= 256.0, "edge multiplicity too large for exact bf16 mask"
    mask = _pad2d(counts, n_pad, n_pad).astype(jnp.bfloat16)
    invd = _pad2d(inv_deg, n_pad, 1)
    return mask, invd


def _forward_padded(args, dims, single_buffer):
    mask, invd, x_bf, w1l_p, w1r_p, b1_p, w2l_p, w2r_p, b2_p = args
    n_pad, fi_pad, hid_pad, out_pad, n_cls, tm = dims
    grid = (n_pad // tm,)

    params = pltpu.CompilerParams(
        dimension_semantics=("parallel",),        # shard row tiles across v7x's 2 TensorCores
        vmem_limit_bytes=_vmem_limit_bytes(),
    )
    tiled = lambda bs: pl.BlockSpec(bs, lambda i: (i, 0))
    if single_buffer:
        # Grid-invariant operands: single-buffer them (double-buffering a constant block
        # only wastes VMEM; matters most on v7x's 64 MiB).
        whole = lambda bs: pl.BlockSpec(bs, lambda i: (0, 0),
                                        pipeline_mode=pl.Buffered(buffer_count=1))
    else:
        whole = lambda bs: pl.BlockSpec(bs, lambda i: (0, 0))

    # TODO(synk): for very large graphs (esp. v7x 64 MiB VMEM) add a K-blocked (neighbor-dim)
    # grid axis with a pl.when-accumulated VMEM scratch instead of whole-array resident x/z.

    # ---- layer 1 (+ fused h @ W2l pre-transform for the reassociated layer 2) ----
    h, z = pl.pallas_call(
        functools.partial(_sage_layer1_kernel, tm),
        grid=grid,
        in_specs=[
            tiled((tm, n_pad)),            # adjacency mask row tile (bf16)
            tiled((tm, 1)),                # 1/deg row tile (f32)
            whole((n_pad, fi_pad)),        # x, all rows (bf16) — also supplies root rows
            whole((fi_pad, hid_pad)),      # W1l (bf16)
            whole((fi_pad, hid_pad)),      # W1r (bf16)
            whole((1, hid_pad)),           # b1 (f32)
            whole((hid_pad, out_pad)),     # W2l (bf16, fused pre-transform)
        ],
        out_specs=[tiled((tm, hid_pad)), tiled((tm, out_pad))],
        out_shape=[
            jax.ShapeDtypeStruct((n_pad, hid_pad), jnp.bfloat16),   # h
            jax.ShapeDtypeStruct((n_pad, out_pad), jnp.bfloat16),   # z = h @ W2l
        ],
        compiler_params=params,
    )(mask, invd, x_bf, w1l_p, w1r_p, b1_p, w2l_p)

    # ---- layer 2: y = A @ z + h @ W2r + b2 ; log_softmax over classes ----
    out = pl.pallas_call(
        functools.partial(_sage_layer2_kernel, n_cls),
        grid=grid,
        in_specs=[
            tiled((tm, n_pad)),            # adjacency mask row tile (bf16)
            tiled((tm, 1)),                # 1/deg row tile (f32)
            whole((n_pad, out_pad)),       # z, all rows (bf16) for aggregation
            tiled((tm, hid_pad)),          # h row tile (bf16) for the root weight
            whole((hid_pad, out_pad)),     # W2r (bf16)
            whole((1, out_pad)),           # b2 (f32)
        ],
        out_specs=tiled((tm, out_pad)),
        out_shape=jax.ShapeDtypeStruct((n_pad, out_pad), jnp.float32),
        compiler_params=params,
    )(mask, invd, z, h, w2r_p, b2_p)
    return out


def sage_forward(x, edge_index, w1l, w1r, b1, w2l, w2r, b2, *, tm=256, graph=None,
                 single_buffer_invariants=True):
    """Fused SAGE forward (inference). Weights stored as (F_in, F_out); biases as (1, F_out)."""
    n, f_in = x.shape
    hid = w1l.shape[1]
    n_cls = w2l.shape[1]

    # Lane-dense padded sizes (multiples of 128) and the node row tile.
    n_pad = _round_up(n, 128)
    fi_pad = _round_up(f_in, 128)
    hid_pad = _round_up(hid, 128)
    out_pad = _round_up(n_cls, 128)

    # Pick the largest row tile that divides n_pad, but keep the grid length >= 2 so both
    # v7x TensorCores get work (no-op on v5e/v6e).
    tm = math.gcd(min(tm, n_pad), n_pad)
    if n_pad // tm < 2 and tm >= 128:
        tm //= 2
    assert n_pad % tm == 0 and tm % 8 == 0

    if graph is None:
        graph = prepare_graph(edge_index, n)           # prefer caching this for static graphs
    mask, invd = graph
    assert mask.shape == (n_pad, n_pad) and invd.shape == (n_pad, 1)

    # All MXU operands in bf16 (fast MXU path, half the HBM/VMEM); biases stay f32.
    x_bf = _pad2d(x, n_pad, fi_pad).astype(jnp.bfloat16)
    w1l_p = _pad2d(w1l, fi_pad, hid_pad).astype(jnp.bfloat16)
    w1r_p = _pad2d(w1r, fi_pad, hid_pad).astype(jnp.bfloat16)
    b1_p = _pad2d(b1, 1, hid_pad)
    w2l_p = _pad2d(w2l, hid_pad, out_pad).astype(jnp.bfloat16)
    w2r_p = _pad2d(w2r, hid_pad, out_pad).astype(jnp.bfloat16)
    b2_p = _pad2d(b2, 1, out_pad)

    args = (mask, invd, x_bf, w1l_p, w1r_p, b1_p, w2l_p, w2r_p, b2_p)
    dims = (n_pad, fi_pad, hid_pad, out_pad, n_cls, tm)

    def run(single_buffer):
        return jax.block_until_ready(_forward_padded(args, dims, single_buffer))

    if single_buffer_invariants:
        try:
            out = run(True)
        except Exception:
            # Graceful fallback if this JAX build rejects pipeline_mode=pl.Buffered(1).
            out = run(False)
    else:
        out = run(False)
    return out[:n, :n_cls]


# -------------------------------- reference ---------------------------------

def reference_forward(x, edge_index, w1l, w1r, b1, w2l, w2r, b2):
    counts, inv_deg = _dense_mean_adjacency(edge_index, x.shape[0])
    a = counts * inv_deg
    h = jnp.maximum(a @ x @ w1l + x @ w1r + b1, 0.0)
    y = a @ h @ w2l + h @ w2r + b2
    return jax.nn.log_softmax(y, axis=1)


if __name__ == "__main__":
    N, IN_FEAT, HID_FEAT, OUT_FEAT = 16, 16, 32, 8

    key = jax.random.PRNGKey(0)
    k_x, k1l, k1r, k1b, k2l, k2r, k2b = jax.random.split(key, 7)

    # Node features
    x = jax.random.normal(k_x, (N, IN_FEAT), jnp.float32)

    # Small deterministic graph: bidirectional ring + chords. edge_index: (2, E)
    idx = jnp.arange(N)
    src = jnp.concatenate([idx, (idx + 1) % N, idx, (idx + 4) % N])
    dst = jnp.concatenate([(idx + 1) % N, idx, (idx + 4) % N, idx])
    edge_index = jnp.stack([src, dst]).astype(jnp.int32)

    # Deterministic parameters (glorot-ish); weights stored as (F_in, F_out).
    def init_w(k, fi, fo):
        return jax.random.normal(k, (fi, fo), jnp.float32) * (1.0 / jnp.sqrt(fi))

    w1l = init_w(k1l, IN_FEAT, HID_FEAT)
    w1r = init_w(k1r, IN_FEAT, HID_FEAT)
    b1 = jax.random.normal(k1b, (1, HID_FEAT), jnp.float32) * 0.01
    w2l = init_w(k2l, HID_FEAT, OUT_FEAT)
    w2r = init_w(k2r, HID_FEAT, OUT_FEAT)
    b2 = jax.random.normal(k2b, (1, OUT_FEAT), jnp.float32) * 0.01

    # Hoisted, cacheable graph preprocessing (dense scatter + padding + bf16 cast).
    graph = prepare_graph(edge_index, N)

    out = sage_forward(x, edge_index, w1l, w1r, b1, w2l, w2r, b2, graph=graph)
    jax.block_until_ready(out)

    ref = reference_forward(x, edge_index, w1l, w1r, b1, w2l, w2r, b2)
    assert out.shape == (N, OUT_FEAT)
    # Tolerance reflects bf16 rounding of all MXU operands across both layers (x, weights, h, z);
    # adjacency normalization, accumulation, and biases stay f32.
    err = float(jnp.max(jnp.abs(out - ref)))
    assert err < 1.5e-1, f"mismatch vs JAX reference: max abs err {err}"

    print("KERNEL_OK")
</pallas_src>

<mosaic_0001>
module attributes {stable_mosaic.version = 11 : i64} {
  func.func @_sage_layer1_kernel(%arg0: i32, %arg1: memref<64x128xbf16, #tpu.memory_space<vmem>>, %arg2: memref<64x1xf32, #tpu.memory_space<vmem>>, %arg3: memref<128x128xbf16, #tpu.memory_space<vmem>>, %arg4: memref<128x128xbf16, #tpu.memory_space<vmem>>, %arg5: memref<128x128xbf16, #tpu.memory_space<vmem>>, %arg6: memref<1x128xf32, #tpu.memory_space<vmem>>, %arg7: memref<128x128xbf16, #tpu.memory_space<vmem>>, %arg8: memref<64x128xbf16, #tpu.memory_space<vmem>>, %arg9: memref<64x128xbf16, #tpu.memory_space<vmem>>) attributes {dimension_semantics = [#tpu.dimension_semantics<parallel>], iteration_bounds = array<i64: 2>, scalar_prefetch = 0 : i64, scratch_operands = 0 : i64, tpu.core_type = #tpu.core_type<tc>, window_params = [{transform_indices = @transform_0, window_bounds = array<i64: 64, 128>}, {transform_indices = @transform_1, window_bounds = array<i64: 64, 1>}, {pipeline_mode = #tpu.pipeline_mode<synchronous>, transform_indices = @transform_2, window_bounds = array<i64: 128, 128>}, {pipeline_mode = #tpu.pipeline_mode<synchronous>, transform_indices = @transform_3, window_bounds = array<i64: 128, 128>}, {pipeline_mode = #tpu.pipeline_mode<synchronous>, transform_indices = @transform_4, window_bounds = array<i64: 128, 128>}, {pipeline_mode = #tpu.pipeline_mode<synchronous>, transform_indices = @transform_5, window_bounds = array<i64: 1, 128>}, {pipeline_mode = #tpu.pipeline_mode<synchronous>, transform_indices = @transform_6, window_bounds = array<i64: 128, 128>}, {transform_indices = @transform_7, window_bounds = array<i64: 64, 128>}, {transform_indices = @transform_8, window_bounds = array<i64: 64, 128>}]} {
    %c0 = arith.constant 0 : index
    %c0_0 = arith.constant 0 : index
    %0 = vector.load %arg2[%c0, %c0_0] : memref<64x1xf32, #tpu.memory_space<vmem>>, vector<64x1xf32>
    %c0_1 = arith.constant 0 : index
    %c0_2 = arith.constant 0 : index
    %1 = vector.load %arg1[%c0_1, %c0_2] : memref<64x128xbf16, #tpu.memory_space<vmem>>, vector<64x128xbf16>
    %c0_3 = arith.constant 0 : index
    %c0_4 = arith.constant 0 : index
    %2 = vector.load %arg3[%c0_3, %c0_4] : memref<128x128xbf16, #tpu.memory_space<vmem>>, vector<128x128xbf16>
    %cst = arith.constant dense<0.000000e+00> : vector<64x128xf32>
    %3 = tpu.matmul %1, %2, %cst {dimension_numbers = #tpu.dot_dimension_numbers<[1], [0], [0], [1], [0, 0, 1, 1], [], []>} : vector<64x128xbf16>, vector<128x128xbf16>, vector<64x128xf32> -> vector<64x128xf32>
    %4 = vector.broadcast %0 : vector<64x1xf32> to vector<64x128xf32>
    %5 = arith.mulf %4, %3 : vector<64x128xf32>
    %c64_i32 = arith.constant 64 : i32
    %6 = arith.muli %arg0, %c64_i32 : i32
    %7 = tpu.assume_multiple %6, 64 : i32
    %8 = arith.index_cast %7 : i32 to index
    %c0_5 = arith.constant 0 : index
    %9 = vector.load %arg3[%8, %c0_5] : memref<128x128xbf16, #tpu.memory_space<vmem>>, vector<64x128xbf16>
    %10 = arith.truncf %5 : vector<64x128xf32> to vector<64x128xbf16>
    %c0_6 = arith.constant 0 : index
    %c0_7 = arith.constant 0 : index
    %11 = vector.load %arg4[%c0_6, %c0_7] : memref<128x128xbf16, #tpu.memory_space<vmem>>, vector<128x128xbf16>
    %cst_8 = arith.constant dense<0.000000e+00> : vector<64x128xf32>
    %12 = tpu.matmul %10, %11, %cst_8 {dimension_numbers = #tpu.dot_dimension_numbers<[1], [0], [0], [1], [0, 0, 1, 1], [], []>} : vector<64x128xbf16>, vector<128x128xbf16>, vector<64x128xf32> -> vector<64x128xf32>
    %c0_9 = arith.constant 0 : index
    %c0_10 = arith.constant 0 : index
    %13 = vector.load %arg5[%c0_9, %c0_10] : memref<128x128xbf16, #tpu.memory_space<vmem>>, vector<128x128xbf16>
    %cst_11 = arith.constant dense<0.000000e+00> : vector<64x128xf32>
    %14 = tpu.matmul %9, %13, %cst_11 {dimension_numbers = #tpu.dot_dimension_numbers<[1], [0], [0], [1], [0, 0, 1, 1], [], []>} : vector<64x128xbf16>, vector<128x128xbf16>, vector<64x128xf32> -> vector<64x128xf32>
    %15 = arith.addf %12, %14 : vector<64x128xf32>
    %c0_12 = arith.constant 0 : index
    %c0_13 = arith.constant 0 : index
    %16 = vector.load %arg6[%c0_12, %c0_13] : memref<1x128xf32, #tpu.memory_space<vmem>>, vector<1x128xf32>
    %17 = vector.broadcast %16 : vector<1x128xf32> to vector<64x128xf32>
    %18 = arith.addf %15, %17 : vector<64x128xf32>
    %cst_14 = arith.constant 0.000000e+00 : f32
    %19 = vector.broadcast %cst_14 : f32 to vector<64x128xf32>
    %20 = arith.maximumf %18, %19 : vector<64x128xf32>
    %21 = arith.truncf %20 : vector<64x128xf32> to vector<64x128xbf16>
    %c0_15 = arith.constant 0 : index
    %c0_16 = arith.constant 0 : index
    %22 = vector.load %arg8[%c0_15, %c0_16] : memref<64x128xbf16, #tpu.memory_space<vmem>>, vector<64x128xbf16>
    tpu.vector_store %arg8[%c0_15, %c0_16], %21 {strides = array<i32>} : memref<64x128xbf16, #tpu.memory_space<vmem>>, vector<64x128xbf16>,
    %c0_17 = arith.constant 0 : index
    %c0_18 = arith.constant 0 : index
    %23 = vector.load %arg7[%c0_17, %c0_18] : memref<128x128xbf16, #tpu.memory_space<vmem>>, vector<128x128xbf16>
    %cst_19 = arith.constant dense<0.000000e+00> : vector<64x128xf32>
    %24 = tpu.matmul %21, %23, %cst_19 {dimension_numbers = #tpu.dot_dimension_numbers<[1], [0], [0], [1], [0, 0, 1, 1], [], []>} : vector<64x128xbf16>, vector<128x128xbf16>, vector<64x128xf32> -> vector<64x128xf32>
    %25 = arith.truncf %24 : vector<64x128xf32> to vector<64x128xbf16>
    %c0_20 = arith.constant 0 : index
    %c0_21 = arith.constant 0 : index
    %26 = vector.load %arg9[%c0_20, %c0_21] : memref<64x128xbf16, #tpu.memory_space<vmem>>, vector<64x128xbf16>
    tpu.vector_store %arg9[%c0_20, %c0_21], %25 {strides = array<i32>} : memref<64x128xbf16, #tpu.memory_space<vmem>>, vector<64x128xbf16>,
    return
  }
  func.func @transform_0(%arg0: i32) -> (i32, i32) {
    %c0_i32 = arith.constant 0 : i32
    %c0_i32_0 = arith.constant 0 : i32
    return %arg0, %c0_i32 : i32, i32
  }
  func.func @transform_1(%arg0: i32) -> (i32, i32) {
    %c0_i32 = arith.constant 0 : i32
    %c0_i32_0 = arith.constant 0 : i32
    return %arg0, %c0_i32 : i32, i32
  }
  func.func @transform_2(%arg0: i32) -> (i32, i32) {
    %c0_i32 = arith.constant 0 : i32
    %c0_i32_0 = arith.constant 0 : i32
    %c0_i32_1 = arith.constant 0 : i32
    return %c0_i32, %c0_i32_0 : i32, i32
  }
  func.func @transform_3(%arg0: i32) -> (i32, i32) {
    %c0_i32 = arith.constant 0 : i32
    %c0_i32_0 = arith.constant 0 : i32
    %c0_i32_1 = arith.constant 0 : i32
    return %c0_i32, %c0_i32_0 : i32, i32
  }
  func.func @transform_4(%arg0: i32) -> (i32, i32) {
    %c0_i32 = arith.constant 0 : i32
    %c0_i32_0 = arith.constant 0 : i32
    %c0_i32_1 = arith.constant 0 : i32
    return %c0_i32, %c0_i32_0 : i32, i32
  }
  func.func @transform_5(%arg0: i32) -> (i32, i32) {
    %c0_i32 = arith.constant 0 : i32
    %c0_i32_0 = arith.constant 0 : i32
    %c0_i32_1 = arith.constant 0 : i32
    return %c0_i32, %c0_i32_0 : i32, i32
  }
  func.func @transform_6(%arg0: i32) -> (i32, i32) {
    %c0_i32 = arith.constant 0 : i32
    %c0_i32_0 = arith.constant 0 : i32
    %c0_i32_1 = arith.constant 0 : i32
    return %c0_i32, %c0_i32_0 : i32, i32
  }
  func.func @transform_7(%arg0: i32) -> (i32, i32) {
    %c0_i32 = arith.constant 0 : i32
    %c0_i32_0 = arith.constant 0 : i32
    return %arg0, %c0_i32 : i32, i32
  }
  func.func @transform_8(%arg0: i32) -> (i32, i32) {
    %c0_i32 = arith.constant 0 : i32
    %c0_i32_0 = arith.constant 0 : i32
    return %arg0, %c0_i32 : i32, i32
  }
}

module attributes {stable_mosaic.version = 11 : i64} {
  func.func @_sage_layer1_kernel(%arg0: i32, %arg1: memref<64x128xbf16, #tpu.memory_space<vmem>>, %arg2: memref<64x1xf32, #tpu.memory_space<vmem>>, %arg3: memref<128x128xbf16, #tpu.memory_space<vmem>>, %arg4: memref<128x128xbf16, #tpu.memory_space<vmem>>, %arg5: memref<128x128xbf16, #tpu.memory_space<vmem>>, %arg6: memref<1x128xf32, #tpu.memory_space<vmem>>, %arg7: memref<128x128xbf16, #tpu.memory_space<vmem>>, %arg8: memref<64x128xbf16, #tpu.memory_space<vmem>>, %arg9: memref<64x128xbf16, #tpu.memory_space<vmem>>) attributes {dimension_semantics = [#tpu.dimension_semantics<parallel>], iteration_bounds = array<i64: 2>, scalar_prefetch = 0 : i64, scratch_operands = 0 : i64, tpu.core_type = #tpu.core_type<tc>, window_params = [{transform_indices = @transform_0, window_bounds = array<i64: 64, 128>}, {transform_indices = @transform_1, window_bounds = array<i64: 64, 1>}, {pipeline_mode = #tpu.pipeline_mode<synchronous>, transform_indices = @transform_2, window_bounds = array<i64: 128, 128>}, {pipeline_mode = #tpu.pipeline_mode<synchronous>, transform_indices = @transform_3, window_bounds = array<i64: 128, 128>}, {pipeline_mode = #tpu.pipeline_mode<synchronous>, transform_indices = @transform_4, window_bounds = array<i64: 128, 128>}, {pipeline_mode = #tpu.pipeline_mode<synchronous>, transform_indices = @transform_5, window_bounds = array<i64: 1, 128>}, {pipeline_mode = #tpu.pipeline_mode<synchronous>, transform_indices = @transform_6, window_bounds = array<i64: 128, 128>}, {transform_indices = @transform_7, window_bounds = array<i64: 64, 128>}, {transform_indices = @transform_8, window_bounds = array<i64: 64, 128>}]} {
    %c0 = arith.constant 0 : index
    %c0_0 = arith.constant 0 : index
    %0 = vector.load %arg2[%c0, %c0_0] : memref<64x1xf32, #tpu.memory_space<vmem>>, vector<64x1xf32>
    %c0_1 = arith.constant 0 : index
    %c0_2 = arith.constant 0 : index
    %1 = vector.load %arg1[%c0_1, %c0_2] : memref<64x128xbf16, #tpu.memory_space<vmem>>, vector<64x128xbf16>
    %c0_3 = arith.constant 0 : index
    %c0_4 = arith.constant 0 : index
    %2 = vector.load %arg3[%c0_3, %c0_4] : memref<128x128xbf16, #tpu.memory_space<vmem>>, vector<128x128xbf16>
    %cst = arith.constant dense<0.000000e+00> : vector<64x128xf32>
    %3 = tpu.matmul %1, %2, %cst {dimension_numbers = #tpu.dot_dimension_numbers<[1], [0], [0], [1], [0, 0, 1, 1], [], []>} : vector<64x128xbf16>, vector<128x128xbf16>, vector<64x128xf32> -> vector<64x128xf32>
    %4 = vector.broadcast %0 : vector<64x1xf32> to vector<64x128xf32>
    %5 = arith.mulf %4, %3 : vector<64x128xf32>
    %c64_i32 = arith.constant 64 : i32
    %6 = arith.muli %arg0, %c64_i32 : i32
    %7 = tpu.assume_multiple %6, 64 : i32
    %8 = arith.index_cast %7 : i32 to index
    %c0_5 = arith.constant 0 : index
    %9 = vector.load %arg3[%8, %c0_5] : memref<128x128xbf16, #tpu.memory_space<vmem>>, vector<64x128xbf16>
    %10 = arith.truncf %5 : vector<64x128xf32> to vector<64x128xbf16>
    %c0_6 = arith.constant 0 : index
    %c0_7 = arith.constant 0 : index
    %11 = vector.load %arg4[%c0_6, %c0_7] : memref<128x128xbf16, #tpu.memory_space<vmem>>, vector<128x128xbf16>
    %cst_8 = arith.constant dense<0.000000e+00> : vector<64x128xf32>
    %12 = tpu.matmul %10, %11, %cst_8 {dimension_numbers = #tpu.dot_dimension_numbers<[1], [0], [0], [1], [0, 0, 1, 1], [], []>} : vector<64x128xbf16>, vector<128x128xbf16>, vector<64x128xf32> -> vector<64x128xf32>
    %c0_9 = arith.constant 0 : index
    %c0_10 = arith.constant 0 : index
    %13 = vector.load %arg5[%c0_9, %c0_10] : memref<128x128xbf16, #tpu.memory_space<vmem>>, vector<128x128xbf16>
    %cst_11 = arith.constant dense<0.000000e+00> : vector<64x128xf32>
    %14 = tpu.matmul %9, %13, %cst_11 {dimension_numbers = #tpu.dot_dimension_numbers<[1], [0], [0], [1], [0, 0, 1, 1], [], []>} : vector<64x128xbf16>, vector<128x128xbf16>, vector<64x128xf32> -> vector<64x128xf32>
    %15 = arith.addf %12, %14 : vector<64x128xf32>
    %c0_12 = arith.constant 0 : index
    %c0_13 = arith.constant 0 : index
    %16 = vector.load %arg6[%c0_12, %c0_13] : memref<1x128xf32, #tpu.memory_space<vmem>>, vector<1x128xf32>
    %17 = vector.broadcast %16 : vector<1x128xf32> to vector<64x128xf32>
    %18 = arith.addf %15, %17 : vector<64x128xf32>
    %cst_14 = arith.constant 0.000000e+00 : f32
    %19 = vector.broadcast %cst_14 : f32 to vector<64x128xf32>
    %20 = arith.maximumf %18, %19 : vector<64x128xf32>
    %21 = arith.truncf %20 : vector<64x128xf32> to vector<64x128xbf16>
    %c0_15 = arith.constant 0 : index
    %c0_16 = arith.constant 0 : index
    %22 = vector.load %arg8[%c0_15, %c0_16] : memref<64x128xbf16, #tpu.memory_space<vmem>>, vector<64x128xbf16>
    tpu.vector_store %arg8[%c0_15, %c0_16], %21 {strides = array<i32>} : memref<64x128xbf16, #tpu.memory_space<vmem>>, vector<64x128xbf16>,
    %c0_17 = arith.constant 0 : index
    %c0_18 = arith.constant 0 : index
    %23 = vector.load %arg7[%c0_17, %c0_18] : memref<128x128xbf16, #tpu.memory_space<vmem>>, vector<128x128xbf16>
    %cst_19 = arith.constant dense<0.000000e+00> : vector<64x128xf32>
    %24 = tpu.matmul %21, %23, %cst_19 {dimension_numbers = #tpu.dot_dimension_numbers<[1], [0], [0], [1], [0, 0, 1, 1], [], []>} : vector<64x128xbf16>, vector<128x128xbf16>, vector<64x128xf32> -> vector<64x128xf32>
    %25 = arith.truncf %24 : vector<64x128xf32> to vector<64x128xbf16>
    %c0_20 = arith.constant 0 : index
    %c0_21 = arith.constant 0 : index
    %26 = vector.load %arg9[%c0_20, %c0_21] : memref<64x128xbf16, #tpu.memory_space<vmem>>, vector<64x128xbf16>
    tpu.vector_store %arg9[%c0_20, %c0_21], %25 {strides = array<i32>} : memref<64x128xbf16, #tpu.memory_space<vmem>>, vector<64x128xbf16>,
    return
  }
  func.func @transform_0(%arg0: i32) -> (i32, i32) {
    %c0_i32 = arith.constant 0 : i32
    %c0_i32_0 = arith.constant 0 : i32
    return %arg0, %c0_i32 : i32, i32
  }
  func.func @transform_1(%arg0: i32) -> (i32, i32) {
    %c0_i32 = arith.constant 0 : i32
    %c0_i32_0 = arith.constant 0 : i32
    return %arg0, %c0_i32 : i32, i32
  }
  func.func @transform_2(%arg0: i32) -> (i32, i32) {
    %c0_i32 = arith.constant 0 : i32
    %c0_i32_0 = arith.constant 0 : i32
    %c0_i32_1 = arith.constant 0 : i32
    return %c0_i32, %c0_i32_0 : i32, i32
  }
  func.func @transform_3(%arg0: i32) -> (i32, i32) {
    %c0_i32 = arith.constant 0 : i32
    %c0_i32_0 = arith.constant 0 : i32
    %c0_i32_1 = arith.constant 0 : i32
    return %c0_i32, %c0_i32_0 : i32, i32
  }
  func.func @transform_4(%arg0: i32) -> (i32, i32) {
    %c0_i32 = arith.constant 0 : i32
    %c0_i32_0 = arith.constant 0 : i32
    %c0_i32_1 = arith.constant 0 : i32
    return %c0_i32, %c0_i32_0 : i32, i32
  }
  func.func @transform_5(%arg0: i32) -> (i32, i32) {
    %c0_i32 = arith.constant 0 : i32
    %c0_i32_0 = arith.constant 0 : i32
    %c0_i32_1 = arith.constant 0 : i32
    return %c0_i32, %c0_i32_0 : i32, i32
  }
  func.func @transform_6(%arg0: i32) -> (i32, i32) {
    %c0_i32 = arith.constant 0 : i32
    %c0_i32_0 = arith.constant 0 : i32
    %c0_i32_1 = arith.constant 0 : i32
    return %c0_i32, %c0_i32_0 : i32, i32
  }
  func.func @transform_7(%arg0: i32) -> (i32, i32) {
    %c0_i32 = arith.constant 0 : i32
    %c0_i32_0 = arith.constant 0 : i32
    return %arg0, %c0_i32 : i32, i32
  }
  func.func @transform_8(%arg0: i32) -> (i32, i32) {
    %c0_i32 = arith.constant 0 : i32
    %c0_i32_0 = arith.constant 0 : i32
    return %arg0, %c0_i32 : i32, i32
  }
}

</mosaic_0001>

<bundles_post_ra>
// kernel: tpu_custom_call.1
= control target key start
LH: loop header
LB: loop body
LE: loop exit
PB: predicated region body
PF: predicated region fallthrough
CT: control target
= control target key end

     0   :  { %14 = vsyncpa [#allocation3], 0  ;;  %s2287_s0 = inlined_call_operand.vmem [shape: bf16[128,128], index: 0, kind: input, shape index: {}]   ;;  %s2288_s1 = inlined_call_operand.vmem [shape: f32[128,1], index: 1, kind: input, shape index: {}]   ;;  %s2289_s2 = inlined_call_operand.vmem [shape: bf16[128,128], index: 2, kind: input, shape index: {}]   ;;  %s2290_s3 = inlined_call_operand.hbm [shape: bf16[128,128], index: 3, kind: input, shape index: {}]   ;;  %s2291_s4 = inlined_call_operand.hbm [shape: bf16[128,128], index: 4, kind: input, shape index: {}]   ;;  %s2292_s5 = inlined_call_operand.vmem [shape: f32[1,128], index: 5, kind: input, shape index: {}]   ;;  %s2293_s6 = inlined_call_operand.hbm [shape: bf16[128,128], index: 6, kind: input, shape index: {}]   ;;  %s2294_s7 = inlined_call_operand.hbm [shape: bf16[128,128], index: 7, kind: output, shape index: {0}]   ;;  %s2295_s8 = inlined_call_operand.hbm [shape: bf16[128,128], index: 8, kind: output, shape index: {1}]  }
   0x1   :  { %15 = vsyncpa [#allocation6], 0 }
   0x2   :  { %16 = vsyncpa [#allocation4], 0 }
   0x3   :  { %18 = vsyncpa [#allocation4 + $0x1], 0 }
   0x4   :  { %19 = vsyncpa [#allocation10], 0 }
   0x5   :  { %21 = vsyncpa [#allocation10 + $0x1], 0  ;;  %s1972_s27 = smov 0   ;;  %s1974_s28 = smov 0  }
   0x6   :  { %s1976_s29 = smov 0   ;;  %s1978_s30 = smov 0  }
   0x7 LB: > { %2303 = sst [smem:[#allocation15_spill]] %s1911_s29  ;;  %s1993_s9 = sadd.s32 4294967295, %s1915_s30   ;;  %s1915_s30 = sphi %s1978_s30, %s2320_s30   ;;  %s1911_s29 = sphi %s1976_s29, %s2325_s29   ;;  %s1907_s28 = sphi %s1974_s28, %s2324_s28   ;;  %s1903_s27 = sphi %s1972_s27, %s2323_s27  }
   0x8   : > { %s1308_s10 = sadd.s32 4294967294, %s1915_s30   ;;  %s1997_s11 = sadd.s32 1, %s1915_s30  }
   0x9   : > { %2304 = sst [smem:[#allocation16_spill]] %s1997_s11  ;;  %s191_s12 = sadd.s32 1, %s1911_s29 }
   0xa   : > { %s188_s13 = ssub.s32 %s1915_s30, %s1997_s11  ;;  %p201_p0 = scmp.ne.s32.totalorder %s1911_s29, %s1907_s28 }
   0xb   : > { %p189_p1 = scmp.eq.s32.totalorder %s188_s13, 0  ;;  %p202_p2 = scmp.eq.s32.totalorder %s1993_s9, 1 }
   0xc   : > { %p207_p3 = scmp.ne.s32.totalorder %s1907_s28, %s1903_s27  ;;  %p208_p4 = scmp.eq.s32.totalorder %s1308_s10, 1 }
   0xd   : > { %s2008_s14 = scalar_select %p189_p1, %s1911_s29, %s191_s12  }
   0xe   : > { %p2010_p5 = por %p202_p2, %p201_p0  ;;  %p2014_p6 = por %p208_p4, %p207_p3 }
   0xf   : > { %2305 = sst [smem:[#allocation17_spill]] %s2008_s14  ;;  %p1309_p7 = scmp.ge.s32.totalorder %s1915_s30, 1 }
  0x10   : > { %s2306_s15 = scalar_select %p2010_p5, 1, 0 }
  0x11   : > { %s2307_s16 = scalar_select %p2014_p6, 1, 0 }
  0x12   : > { %p241_p8 = scmp.lt.s32.totalorder %s1915_s30, 3  ;;  %p2296_p9 = scmp.eq.s32.totalorder %s1993_s9, 0 }
  0x13   : > { %2308 = sst [smem:[#allocation18_spill]] %s2307_s16  ;;  %s1917_s18 = smov [#allocation5]  }
  0x14   : > { %p2021_p10 = pnand %p1309_p7, %p241_p8  ;;  %s269_s19 = sshll.u32 %s1917_s18, 4  ;;  %s2027_s19 = int_to_ptr.vmem [resolvable:$true] %s269_s19 }
  0x15   : > { %s1918_s21 = smov [#allocation2]   ;;  %s1919_s23 = smov [#allocation7]  }
  0x16   : > { %s2309_s17 = scalar_select %p2021_p10, 1, 0 }
  0x17   : > { %p1623_p11 = pneg %p2021_p10  ;;  %s256_s22 = sshll.u32 %s1918_s21, 4  ;;  %s2035_s22 = int_to_ptr.vmem [resolvable:$true] %s256_s22 }
  0x18   : > { %s2037_s24 = sshll.u32 %s1919_s23, 4  ;;  %s1729_s10 = scalar_lea.hbm %s2291_s4, 1024  ;;  %s286_s24 = int_to_ptr.vmem [resolvable:$true] %s2037_s24 }
  0x19   : > { %p2031_p12 = pnand %p2296_p9, %p1623_p11  ;;  %p1730_p13 = scmp.ne.s32.totalorder %s2291_s4, %s1729_s10 }
  0x1a   : > { %p1736_p3 = scmp.lt.u32.totalorder %s1729_s10, %s2291_s4 }
  0x1b   : > { %p2047_p0 = pneg %p2031_p12 }
  0x1d   : > { %p1732_p1 = pnand %p2047_p0, %p1730_p13 }
  0x1f   : > { %p1733_p2 = pneg %p1732_p1 }
  0x21   : > { %p1738_p4 = pnand %p1736_p3, %p1733_p2 }
  0x23   : > { %1741 = shalt.err (!%p1738_p4)
}
  0x24   : > { %s1742_s25 = scalar_lea.vmem %s2027_s19, 1024  ;;  %p1750_p9 = scmp.lt.s32.totalorder %s2027_s19, %s2027_s19 }
  0x25   : > { %p1743_p7 = scmp.ne.s32.totalorder %s2027_s19, %s1742_s25  ;;  %p1751_p6 = scmp.lt.s32.totalorder %s1742_s25, %s1742_s25 }
  0x27   : > { %p1745_p8 = pnand %p1743_p7, %p2047_p0  ;;  %p1752_p13 = por %p1751_p6, %p1750_p9 }
  0x29   : > { %p1746_p11 = pneg %p1745_p8 }
  0x2b   : > { %p1753_p1 = pnand %p1752_p13, %p1746_p11 }
  0x2d   : > { %1756 = shalt.err (!%p1753_p1)
}
  0x2e   : > { %s1920_s26 = smov 64   ;;  %s1921_s10 = smov 4  }
  0x2f   : > { %1629 = dma.hbm_to_vmem [thread:$0]  (!%p2031_p12), %s2291_s4, 1024, %s2027_s19, [#allocation6], %s1920_s26, %s1920_s26, %s1921_s10  }
  0x30   : > { %s1757_s25 = scalar_lea.hbm %s2290_s3, 1024 }
  0x31   : > { %p1758_p6 = scmp.ne.s32.totalorder %s2290_s3, %s1757_s25  ;;  %p1764_p3 = scmp.lt.u32.totalorder %s1757_s25, %s2290_s3 }
  0x33   : > { %p1760_p9 = pnand %p1758_p6, %p2047_p0 }
  0x35   : > { %p1761_p2 = pneg %p1760_p9 }
  0x37   : > { %p1766_p4 = pnand %p1764_p3, %p1761_p2 }
  0x39   : > { %1769 = shalt.err (!%p1766_p4)
}
  0x3a   : > { %s1770_s19 = scalar_lea.vmem %s2035_s22, 1024  ;;  %p1778_p13 = scmp.lt.s32.totalorder %s2035_s22, %s2035_s22 }
  0x3b   : > { %p1771_p7 = scmp.ne.s32.totalorder %s2035_s22, %s1770_s19  ;;  %p1779_p1 = scmp.lt.s32.totalorder %s1770_s19, %s1770_s19 }
  0x3d   : > { %p1773_p8 = pnand %p1771_p7, %p2047_p0  ;;  %p1780_p6 = por %p1779_p1, %p1778_p13 }
  0x3f   : > { %p1774_p11 = pneg %p1773_p8 }
  0x41   : > { %p1781_p9 = pnand %p1780_p6, %p1774_p11 }
  0x43   : > { %1784 = shalt.err (!%p1781_p9)
}
  0x44   : > { %1626 = dma.hbm_to_vmem [thread:$0]  (!%p2031_p12), %s2290_s3, 1024, %s2035_s22, [#allocation3], %s1920_s26, %s1920_s26, %s1921_s10  }
  0x45   : > { %s1785_s12 = scalar_lea.hbm %s2293_s6, 1024 }
  0x46   : > { %p1786_p2 = scmp.ne.s32.totalorder %s2293_s6, %s1785_s12  ;;  %p1792_p7 = scmp.lt.u32.totalorder %s1785_s12, %s2293_s6 }
  0x48   : > { %p1788_p3 = pnand %p1786_p2, %p2047_p0 }
  0x4a   : > { %p1789_p4 = pneg %p1788_p3 }
  0x4c   : > { %p1794_p8 = pnand %p1792_p7, %p1789_p4 }
  0x4e   : > { %1797 = shalt.err (!%p1794_p8)
}
  0x4f   : > { %s1798_s19 = scalar_lea.vmem %s286_s24, 1024  ;;  %p1806_p6 = scmp.lt.s32.totalorder %s286_s24, %s286_s24 }
  0x50   : > { %p1799_p11 = scmp.ne.s32.totalorder %s286_s24, %s1798_s19  ;;  %p1807_p9 = scmp.lt.s32.totalorder %s1798_s19, %s1798_s19 }
  0x52   : > { %p1801_p13 = pnand %p1799_p11, %p2047_p0  ;;  %p1808_p5 = por %p1807_p9, %p1806_p6 }
  0x54   : > { %p1802_p1 = pneg %p1801_p13 }
  0x56   : > { %p1809_p10 = pnand %p1808_p5, %p1802_p1 }
  0x58   : > { %1812 = shalt.err (!%p1809_p10)
}
  0x59   : > { %1632 = dma.hbm_to_vmem [thread:$0]  (!%p2031_p12), %s2293_s6, 1024, %s286_s24, [#allocation6], %s1920_s26, %s1920_s26, %s1921_s10  }
  0x5a   : > { %p2312_p2 = scmp.ne.s32.totalorder %s2309_s17, 0 }
  0x5b   : > { %p2313_p0 = scmp.eq.s32.totalorder (!%p2312_p2), %s1993_s9, 0 }
  0x5c   : > { %319 = sbr.rel (%p2312_p2) target bundleno = 818 (0x332), region = 48 }
  0x63   : > { %1886 = dma.done.wait (%p2313_p0), [#allocation3], 1024   ;;  %p2314_p3 = pmov %p2313_p0 }
  0x64   : > { %p2315_p5 = pmov %p2313_p0 }
  0x65   : > { %1888 = vsyncadd (%p2314_p3), [#allocation3], 4294966272 }
  0x66   : > { %1890 = dma.done.wait (%p2315_p5), [#allocation6], 2048   ;;  %p2316_p10 = pmov %p2313_p0 }
  0x67   : > { %s1320_s20 = sshll.u32 %s1993_s9, 3  ;;  %v1922_v0 = vmov 0   ;;  %v1689_v1 = vld [vmem:[%s2289_s2] sm:$0xff]   ;;  %v1690_v2 = vld [vmem:[%s2289_s2 + $0x8] sm:$0xff]   ;;  %v1691_v3 = vld [vmem:[%s2289_s2 + $0x10] sm:$0xff]   ;;  %s1336_s17 = sshll.u32 %s1993_s9, 6 }
  0x68   : > { %1892 = vsyncadd (%p2316_p10), [#allocation6], 4294965248  ;;  %p372_p4 = scmp.lt.s32.totalorder %s1320_s20, 15  ;;  %1687 = vset.pattern.permute.xlu0 %v1922_v0  ;;  %1688 = vset.pattern.permute.xlu1 %v1922_v0  ;;  %v1692_v4 = vld [vmem:[%s2289_s2 + $0x18] sm:$0xff]   ;;  %v1693_v6 = vld [vmem:[%s2289_s2 + $0x20] sm:$0xff]   ;;  %s1407_s18 = sshll.u32 %s1993_s9, 9 }
  0x69   : > { %1503 = vmatprep.subr.bf16.mxu0 %v1689_v1  ;;  %v1694_v9 = vld [vmem:[%s2289_s2 + $0x28] sm:$0xff]   ;;  %v1701_v12 = vld [vmem:[#allocation5] sm:$0xff]   ;;  %v1695_v16 = vld [vmem:[%s2289_s2 + $0x30] sm:$0xff]   ;;  %p2317_p7 = scmp.ne.s32.totalorder %s2306_s15, 0  ;;  %s1923_s12 = smov [#allocation8]  }
  0x6a   : > { %s2327_s20 = smov (!%p372_p4, %s1320_s20), 15  ;;  %1504 = vmatpush3.bf16.msra.mxu0 %v1689_v1  ;;  %v1702_v13 = vld [vmem:[#allocation5 + $0x8] sm:$0xff]   ;;  %1527 = vmatprep.subr.bf16.mxu1 %v1701_v12  ;;  %v1703_v17 = vld [vmem:[#allocation5 + $0x10] sm:$0xff]   ;;  %v1696_v19 = vld [vmem:[%s2289_s2 + $0x38] sm:$0xff]  }
  0x6b   : > { %s1321_s10 = sshll.u32 %s2327_s20, 2  ;;  %1505 = vmatprep.subr.bf16.mxu0 %v1690_v2  ;;  %s1323_s21 = sshll.u32 %s2327_s20, 3  ;;  %1528 = vmatpush3.bf16.msra.mxu1 %v1701_v12  ;;  %v1704_v22 = vld [vmem:[#allocation5 + $0x18] sm:$0xff]   ;;  %v1705_v24 = vld [vmem:[#allocation5 + $0x20] sm:$0xff]   ;;  %v1706_v26 = vld [vmem:[#allocation5 + $0x28] sm:$0xff]  }
  0x6c   : > { %s2142_s13 = scalar_lea.vmem %s2287_s0, %s1321_s10  ;;  %s2151_s29 = scalar_lea.vmem %s2288_s1, %s1323_s21  ;;  %1529 = vmatprep.subr.bf16.mxu1 %v1702_v13  ;;  %v1707_v27 = vld [vmem:[#allocation5 + $0x30] sm:$0xff]   ;;  %v1708_v29 = vld [vmem:[#allocation5 + $0x38] sm:$0xff]   ;;  %v1710_v30 = vld [vmem:[#allocation2] sm:$0xff]  }
  0x6d   : > { %v1697_v5 = vld [vmem:[%s2142_s13] sm:$0xff]   ;;  %v388_v8 = vld [vmem:[%s2151_s29 + $0x10] sm:$0xff]  ;;  %v387_v10 = vld [vmem:[%s2151_s29 + $0x8] sm:$0xff]  ;;  %s604_s10 = sshra.s32 %s1336_s17, 3  ;;  %s1817_s21 = sshll.u32 %s1923_s12, 4  ;;  %s1818_s21 = int_to_ptr.vmem [resolvable:$false] %s1817_s21 }
  0x6e   : > { %1506 = vmatpush3.bf16.msra.mxu0 %v1690_v2  ;;  %1519 = vmatprep.mubr.bf16.mxu0 %v1697_v5  ;;  %v386_v7 = vld [vmem:[%s2151_s29] sm:$0xff]  ;;  %v389_v11 = vld [vmem:[%s2151_s29 + $0x18] sm:$0xff]  ;;  %s1337_s11 = sshll.u32 %s604_s10, 2  ;;  %v391_v15 = vld [vmem:[%s2151_s29 + $0x28] sm:$0xff] }
  0x6f   : > { %1507 = vmatprep.subr.bf16.mxu0 %v1691_v3  ;;  %557 = vperm.xlu0 %1687, %v386_v7   ;;  %v390_v14 = vld [vmem:[%s2151_s29 + $0x20] sm:$0xff]  ;;  %s2172_s23 = scalar_lea.vmem %s2289_s2, %s1337_s11  ;;  %v392_v18 = vld [vmem:[%s2151_s29 + $0x30] sm:$0xff]  ;;  %v393_v20 = vld [vmem:[%s2151_s29 + $0x38] sm:$0xff]  ;;  %s2190_s29 = sand.u32 1, %s1907_s28  }
  0x70   : > { %567 = vperm.xlu1 %1688, %v388_v8   ;;  %1530 = vmatpush3.bf16.msra.mxu1 %v1702_v13  ;;  %v1709_v21 = vld [vmem:[%s2172_s23] sm:$0xff]   ;;  %v1698_v23 = vld [vmem:[%s2142_s13 + $0x8] sm:$0xff]   ;;  %v1699_v25 = vld [vmem:[%s2142_s13 + $0x10] sm:$0xff]   ;;  %s1318_s17 = sshll.u32 %s2190_s29, 5  ;;  %s2203_s11 = scalar_lea.hbm %s2294_s7, %s1407_s18 }
  0x71   : > { %1531 = vmatprep.subr.bf16.mxu1 %v1703_v17  ;;  %1543 = vmatprep.mubr.bf16.mxu1 %v1709_v21  ;;  %v1700_v28 = vld [vmem:[%s2142_s13 + $0x18] sm:$0xff]   ;;  %v1711_v31 = vld [vmem:[%s2172_s23 + $0x8] sm:$0xff]   ;;  %v1713_v33 = vld [vmem:[#allocation2 + $0x10] sm:$0xff]   ;;  %s363_s20 = scalar_lea.vmem [#allocation8], %s1318_s17  ;;  %s1135_s14 = scalar_lea.sflag [#allocation4], %s2190_s29 }
  0x72   : > { %1508 = vmatpush3.bf16.msra.mxu0 %v1691_v3  ;;  %v1712_v32 = vld [vmem:[#allocation2 + $0x8] sm:$0xff]   ;;  %v1714_v34 = vld [vmem:[#allocation2 + $0x18] sm:$0xff]   ;;  %v1715_v35 = vld [vmem:[#allocation2 + $0x20] sm:$0xff]   ;;  %s1153_s24 = sshll.u32 %s363_s20, 4  ;;  %s2195_s24 = int_to_ptr.vmem [resolvable:$true] %s1153_s24 }
  0x73   : > { %1509 = vmatprep.subr.bf16.mxu0 %v1692_v4  ;;  %562 = vperm.xlu0 %1687, %v387_v10   ;;  %v1716_v36 = vld [vmem:[#allocation2 + $0x28] sm:$0xff]   ;;  %v1717_v37 = vld [vmem:[%s2172_s23 + $0x10] sm:$0xff]   ;;  %v1718_v38 = vld [vmem:[%s2172_s23 + $0x18] sm:$0xff]   ;;  %s1813_s16 = scalar_lea.vmem %s2195_s24, 512  ;;  %s1819_s23 = scalar_lea.vmem %s1818_s21, 1024 }
  0x74   : > { %572 = vperm.xlu1 %1688, %v389_v11   ;;  %1532 = vmatpush3.bf16.msra.mxu1 %v1703_v17  ;;  %v1719_v39 = vld [vmem:[#allocation2 + $0x30] sm:$0xff]   ;;  %v1720_v40 = vld [vmem:[#allocation2 + $0x38] sm:$0xff]   ;;  %v1721_v41 = vld [vmem:[#allocation7] sm:$0xff]   ;;  %p1814_p12 = scmp.ne.s32.totalorder %s2195_s24, %s1813_s16  ;;  %p1820_p13 = scmp.lt.s32.totalorder %s2195_s24, %s1818_s21 }
  0x75   : > { %1533 = vmatprep.subr.bf16.mxu1 %v1704_v22  ;;  %v1722_v42 = vld [vmem:[#allocation7 + $0x8] sm:$0xff]   ;;  %v1723_v43 = vld [vmem:[#allocation7 + $0x10] sm:$0xff]   ;;  %v1724_v44 = vld [vmem:[#allocation7 + $0x18] sm:$0xff]   ;;  %p1821_p1 = scmp.lt.s32.totalorder %s1819_s23, %s1813_s16 }
  0x76   : > { %1510 = vmatpush3.bf16.msra.mxu0 %v1692_v4  ;;  %v1725_v45 = vld [vmem:[#allocation7 + $0x20] sm:$0xff]   ;;  %v1726_v46 = vld [vmem:[#allocation7 + $0x28] sm:$0xff]   ;;  %v1727_v11 = vld [vmem:[#allocation7 + $0x30] sm:$0xff]   ;;  %p1815_p8 = pnand %p1814_p12, %p2317_p7 }
  0x77   : > { %1511 = vmatprep.subr.bf16.mxu0 %v1693_v6  ;;  %577 = vperm.xlu0 %1687, %v390_v14   ;;  %v1728_v12 = vld [vmem:[#allocation7 + $0x38] sm:$0xff]   ;;  %v1358_v13 = vld [vmem:[%s2292_s5] ss:$0 sm:$0xff]  ;;  %p1822_p6 = por %p1821_p1, %p1820_p13 }
  0x78   : > { %582 = vperm.xlu1 %1688, %v391_v15   ;;  %1534 = vmatpush3.bf16.msra.mxu1 %v1704_v22  ;;  %p1816_p11 = pneg %p1815_p8 }
  0x79   : > { %1535 = vmatprep.subr.bf16.mxu1 %v1705_v24 }
  0x7a   : > { %1512 = vmatpush3.bf16.msra.mxu0 %v1693_v6  ;;  %p1823_p9 = pnand %p1822_p6, %p1816_p11 }
  0x7b   : > { %1513 = vmatprep.subr.bf16.mxu0 %v1694_v9  ;;  %587 = vperm.xlu0 %1687, %v392_v18  }
  0x7c   : > { %592 = vperm.xlu1 %1688, %v393_v20   ;;  %1536 = vmatpush3.bf16.msra.mxu1 %v1705_v24 }
  0x7d   : > { %1537 = vmatprep.subr.bf16.mxu1 %v1706_v26 }
  0x7e   : > { %1514 = vmatpush3.bf16.msra.mxu0 %v1694_v9 }
  0x7f   : > { %1515 = vmatprep.subr.bf16.mxu0 %v1695_v16 }
  0x80   : > { %1538 = vmatpush3.bf16.msra.mxu1 %v1706_v26 }
  0x81   : > { %1539 = vmatprep.subr.bf16.mxu1 %v1707_v27 }
  0x82   : > { %1516 = vmatpush3.bf16.msra.mxu0 %v1695_v16 }
  0x83   : > { %1517 = vmatprep.subr.bf16.mxu0 %v1696_v19 }
  0x84   : > { %1540 = vmatpush3.bf16.msra.mxu1 %v1707_v27 }
  0x85   : > { %1541 = vmatprep.subr.bf16.mxu1 %v1708_v29 }
  0x86   : > { %1518 = vmatpush3.bf16.msra.mxu0 %v1696_v19 }
  0x87   : > { %1575 = vmatprep.subr.bf16.mxu0 %v1721_v41 }
  0x88   : > { %1542 = vmatpush3.bf16.msra.mxu1 %v1708_v29 }
  0x89   : > { %1520 = vmatmul.mubr.bf16.vlgmr.msra.gmra.mrb[0].mxu0 %v1698_v23  ;;  %1551 = vmatprep.subr.bf16.mxu1 %v1710_v30 }
  0x8a   : > { %1523 = vmatprep.mubr.bf16.mxu0 %v1699_v25  ;;  %1576 = vmatpush3.bf16.msra.mxu0 %v1721_v41 }
  0x8b   : > { %1544 = vmatmul.mubr.bf16.vlgmr.msra.gmra.mrb[0].mxu1 %v1711_v31  ;;  %1577 = vmatprep.subr.bf16.mxu0 %v1722_v42 }
  0x8c   : > { %1552 = vmatpush3.bf16.msra.mxu1 %v1710_v30  ;;  %1547 = vmatprep.mubr.bf16.mxu1 %v1717_v37 }
  0x8d   : > { %1553 = vmatprep.subr.bf16.mxu1 %v1712_v32 }
  0x8e   : > { %1578 = vmatpush3.bf16.msra.mxu0 %v1722_v42 }
  0x8f   : > { %1579 = vmatprep.subr.bf16.mxu0 %v1723_v43 }
  0x90   : > { %1554 = vmatpush3.bf16.msra.mxu1 %v1712_v32 }
  0x91   : > { %1524 = vmatmul.mubr.bf16.gmra.mrb[4].mxu0 %v1700_v28  ;;  %1555 = vmatprep.subr.bf16.mxu1 %v1713_v33 }
  0x92   : > { %1580 = vmatpush3.bf16.msra.mxu0 %v1723_v43 }
  0x93   : > { %1548 = vmatmul.mubr.bf16.gmra.mrb[4].mxu1 %v1718_v38  ;;  %1581 = vmatprep.subr.bf16.mxu0 %v1724_v44 }
  0x94   : > { %1556 = vmatpush3.bf16.msra.mxu1 %v1713_v33 }
  0x95   : > { %1557 = vmatprep.subr.bf16.mxu1 %v1714_v34 }
  0x96   : > { %1582 = vmatpush3.bf16.msra.mxu0 %v1724_v44 }
  0x97   : > { %1583 = vmatprep.subr.bf16.mxu0 %v1725_v45 }
  0x98   : > { %1558 = vmatpush3.bf16.msra.mxu1 %v1714_v34 }
  0x99   : > { %1559 = vmatprep.subr.bf16.mxu1 %v1715_v35 }
  0x9a   : > { %1584 = vmatpush3.bf16.msra.mxu0 %v1725_v45 }
  0x9b   : > { %1585 = vmatprep.subr.bf16.mxu0 %v1726_v46 }
  0x9c   : > { %1560 = vmatpush3.bf16.msra.mxu1 %v1715_v35 }
  0x9d   : > { %1561 = vmatprep.subr.bf16.mxu1 %v1716_v36 }
  0x9e   : > { %1586 = vmatpush3.bf16.msra.mxu0 %v1726_v46 }
  0x9f   : > { %1587 = vmatprep.subr.bf16.mxu0 %v1727_v11 }
  0xa0   : > { %1562 = vmatpush3.bf16.msra.mxu1 %v1716_v36 }
  0xa1   : > { %1563 = vmatprep.subr.bf16.mxu1 %v1719_v39 }
  0xa2   : > { %1588 = vmatpush3.bf16.msra.mxu0 %v1727_v11 }
  0xa3   : > { %1589 = vmatprep.subr.bf16.mxu0 %v1728_v12 }
  0xa4   : > { %1564 = vmatpush3.bf16.msra.mxu1 %v1719_v39 }
  0xa5   : > { %1565 = vmatprep.subr.bf16.mxu1 %v1720_v40 }
  0xa6   : > { %1590 = vmatpush3.bf16.msra.mxu0 %v1728_v12 }
  0xa8   : > { %1566 = vmatpush3.bf16.msra.mxu1 %v1720_v40 }
  0xee   : > { %v558_v47 = vpop.permute.xlu0 %557 }
  0xef   : > { %v568_v48 = vpop.permute.xlu1 %567 }
  0xf2   : > { %v563_v49 = vpop.permute.xlu0 %562 }
  0xf3   : > { %v573_v50 = vpop.permute.xlu1 %572 }
  0xf6   : > { %v578_v54 = vpop.permute.xlu0 %577 }
  0xf7   : > { %v583_v58 = vpop.permute.xlu1 %582 }
  0xfa   : > { %v588_v0 = vpop.permute.xlu0 %587 }
  0xfb   : > { %v593_v2 = vpop.permute.xlu1 %592 }
 0x15c   : > { %v1521_v51 = vpop.f32.mrb[0].mxu0 }
 0x15d   : > { %v524_v52 = vpop.f32.mrb[1].mxu0  ;;  %v597_v55 = vmul.f32 %v1521_v51, %v568_v48 }
 0x15e   : > { %v1522_v53 = vpop.f32.mrb[2].mxu0  ;;  %v595_v59 = vmul.f32 %v558_v47, %v524_v52 }
 0x15f   : > { %v598_v56 = vmul.f32 %v1522_v53, %v573_v50  ;;  %v527_v57 = vpop.f32.mrb[3].mxu0 }
 0x160   : > { %v596_v60 = vmul.f32 %v563_v49, %v527_v57 }
 0x161   : > { %v617_v61 = vpack.c.bf16 %v598_v56, %v597_v55 }
 0x162   : > { %v616_v62 = vpack.c.bf16 %v596_v60, %v595_v59 }
 0x164   : > { %v1525_v63 = vpop.f32.mrb[4].mxu0  ;;  %1567 = vmatprep.mubr.bf16.mxu1 %v616_v62 }
 0x165   : > { %v540_v1 = vpop.f32.mrb[5].mxu0  ;;  %1568 = vmatmul.mubr.bf16.vlgmr.msra.gmra.mrb[0].mxu1 %v617_v61  ;;  %v601_v4 = vmul.f32 %v1525_v63, %v588_v0 }
 0x166   : > { %v1526_v3 = vpop.f32.mrb[6].mxu0  ;;  %v599_v7 = vmul.f32 %v578_v54, %v540_v1 }
 0x167   : > { %v602_v5 = vmul.f32 %v1526_v3, %v593_v2  ;;  %v543_v6 = vpop.f32.mrb[7].mxu0 }
 0x168   : > { %v600_v8 = vmul.f32 %v583_v58, %v543_v6 }
 0x169   : > { %v619_v9 = vpack.c.bf16 %v602_v5, %v601_v4 }
 0x16a   : > { %v618_v10 = vpack.c.bf16 %v600_v8, %v599_v7 }
 0x16c   : > { %1571 = vmatprep.mubr.bf16.mxu1 %v618_v10 }
 0x16d   : > { %1572 = vmatmul.mubr.bf16.gmra.mrb[4].mxu1 %v619_v9 }
 0x238   : > { %v1569_v14 = vpop.f32.mrb[0].mxu1 }
 0x239   : > { %v911_v15 = vadd.f32 %v1569_v14, %v1358_v13  ;;  %v871_v16 = vpop.f32.mrb[1].mxu1 }
 0x23a   : > { %v909_v17 = vadd.f32 %v1358_v13, %v871_v16  ;;  %v1570_v18 = vpop.f32.mrb[2].mxu1 }
 0x23b   : > { %v912_v19 = vadd.f32 %v1570_v18, %v1358_v13  ;;  %v874_v20 = vpop.f32.mrb[3].mxu1  ;;  %v919_v22 = vmax.f32 %v911_v15, 0.0 }
 0x23c   : > { %v910_v21 = vadd.f32 %v1358_v13, %v874_v20  ;;  %v917_v24 = vmax.f32 %v909_v17, 0.0 }
 0x23d   : > { %v920_v23 = vmax.f32 %v912_v19, 0.0 }
 0x23e   : > { %v918_v25 = vmax.f32 %v910_v21, 0.0 }
 0x23f   : > { %v926_v26 = vpack.c.bf16 %v920_v23, %v919_v22 }
 0x240   : > { %v925_v27 = vpack.c.bf16 %v918_v25, %v917_v24  ;;  %v1573_v28 = vpop.f32.mrb[4].mxu1 }
 0x241   : > { %1449 = vst [vmem:[%s363_s20 + $0x8] sm:$0xff] %v926_v26   ;;  %v915_v29 = vadd.f32 %v1573_v28, %v1358_v13  ;;  %v887_v30 = vpop.f32.mrb[5].mxu1 }
 0x242   : > { %1413 = vst [vmem:[%s363_s20] sm:$0xff] %v925_v27   ;;  %v913_v31 = vadd.f32 %v1358_v13, %v887_v30  ;;  %v1574_v32 = vpop.f32.mrb[6].mxu1  ;;  %1591 = vmatprep.mubr.bf16.mxu0 %v925_v27 }
 0x243   : > { %v916_v33 = vadd.f32 %v1574_v32, %v1358_v13  ;;  %v890_v34 = vpop.f32.mrb[7].mxu1  ;;  %1592 = vmatmul.mubr.bf16.vlgmr.msra.gmra.mrb[8].mxu0 %v926_v26  ;;  %v923_v36 = vmax.f32 %v915_v29, 0.0 }
 0x244   : > { %v914_v35 = vadd.f32 %v1358_v13, %v890_v34  ;;  %v921_v38 = vmax.f32 %v913_v31, 0.0 }
 0x245   : > { %v924_v37 = vmax.f32 %v916_v33, 0.0 }
 0x246   : > { %v922_v39 = vmax.f32 %v914_v35, 0.0 }
 0x247   : > { %v928_v40 = vpack.c.bf16 %v924_v37, %v923_v36 }
 0x248   : > { %v927_v41 = vpack.c.bf16 %v922_v39, %v921_v38 }
 0x249   : > { %1451 = vst [vmem:[%s363_s20 + $0x18] sm:$0xff] %v928_v40  }
 0x24a   : > { %1450 = vst [vmem:[%s363_s20 + $0x10] sm:$0xff] %v927_v41   ;;  %1595 = vmatprep.mubr.bf16.mxu0 %v927_v41 }
 0x24b   : > { %1596 = vmatmul.mubr.bf16.gmra.mrb[12].mxu0 %v928_v40 }
 0x24c   : > { %1826 = shalt.err (!%p1823_p9)
}
 0x24d   : > { %s1827_s25 = scalar_lea.hbm %s2203_s11, 512  ;;  %s1831_s22 = scalar_lea.hbm %s2294_s7, 1024 }
 0x24e   : > { %p1828_p2 = scmp.ne.s32.totalorder %s2203_s11, %s1827_s25  ;;  %p1832_p5 = scmp.lt.u32.totalorder %s2203_s11, %s2294_s7 }
 0x24f   : > { %p1833_p10 = scmp.lt.u32.totalorder %s1831_s22, %s1827_s25  ;;  %p1835_p12 = scmp.lt.u32.totalorder %s1827_s25, %s2203_s11 }
 0x250   : > { %p1829_p0 = pnand %p1828_p2, %p2317_p7 }
 0x251   : > { %p1834_p4 = por %p1833_p10, %p1832_p5 }
 0x252   : > { %p1830_p3 = pneg %p1829_p0 }
 0x253   : > { %p1836_p8 = por %p1835_p12, %p1834_p4 }
 0x255   : > { %p1837_p11 = pnand %p1836_p8, %p1830_p3 }
 0x257   : > { %1840 = shalt.err (!%p1837_p11)
}
 0x258   : > { %s1924_s10 = smov 64   ;;  %s1925_s16 = smov 4  }
 0x259   : > { %1619 = dma.vmem_to_hbm [thread:$0]  (%p2317_p7), %s2195_s24, 512, %s2203_s11, %s1135_s14, %s1924_s10, %s1924_s10, %s1925_s16  }
 0x25a   : > { %s370_s12 = scalar_lea.vmem [#allocation9], %s1318_s17  ;;  %s2241_s17 = scalar_lea.hbm %s2295_s8, %s1407_s18 }
 0x25b   : > { %s1169_s21 = sshll.u32 %s370_s12, 4  ;;  %s1140_s14 = scalar_lea.sflag [#allocation10], %s2190_s29  ;;  %s2234_s21 = int_to_ptr.vmem [resolvable:$true] %s1169_s21 }
 0x25c   : > { %s1841_s23 = scalar_lea.vmem %s2234_s21, 512  ;;  %s1926_s25 = smov [#allocation9]  }
 0x25d   : > { %p1842_p13 = scmp.ne.s32.totalorder %s2234_s21, %s1841_s23  ;;  %s1845_s19 = sshll.u32 %s1926_s25, 4  ;;  %s1846_s19 = int_to_ptr.vmem [resolvable:$false] %s1845_s19 }
 0x25e   : > { %s1847_s13 = scalar_lea.vmem %s1846_s19, 1024  ;;  %p1848_p9 = scmp.lt.s32.totalorder %s2234_s21, %s1846_s19 }
 0x25f   : > { %p1843_p1 = pnand %p1842_p13, %p2317_p7  ;;  %p1849_p2 = scmp.lt.s32.totalorder %s1847_s13, %s1841_s23 }
 0x261   : > { %p1844_p6 = pneg %p1843_p1  ;;  %p1850_p0 = por %p1849_p2, %p1848_p9 }
 0x263   : > { %p1851_p3 = pnand %p1850_p0, %p1844_p6 }
 0x316   : > { %v1593_v42 = vpop.f32.mrb[8].mxu0 }
 0x317   : > { %v1063_v43 = vpop.f32.mrb[9].mxu0 }
 0x318   : > { %v1594_v44 = vpop.f32.mrb[10].mxu0 }
 0x319   : > { %v1437_v45 = vpack.c.bf16 %v1594_v44, %v1593_v42  ;;  %v1066_v46 = vpop.f32.mrb[11].mxu0 }
 0x31a   : > { %v1432_v47 = vpack.c.bf16 %v1066_v46, %v1063_v43 }
 0x31b   : > { %1452 = vst [vmem:[%s370_s12 + $0x8] sm:$0xff] %v1437_v45  }
 0x31c   : > { %1433 = vst [vmem:[%s370_s12] sm:$0xff] %v1432_v47  }
 0x31e   : > { %v1597_v48 = vpop.f32.mrb[12].mxu0 }
 0x31f   : > { %v1079_v49 = vpop.f32.mrb[13].mxu0 }
 0x320   : > { %v1598_v50 = vpop.f32.mrb[14].mxu0 }
 0x321   : > { %v1447_v51 = vpack.c.bf16 %v1598_v50, %v1597_v48  ;;  %v1082_v52 = vpop.f32.mrb[15].mxu0 }
 0x322   : > { %v1442_v53 = vpack.c.bf16 %v1082_v52, %v1079_v49 }
 0x323   : > { %1454 = vst [vmem:[%s370_s12 + $0x18] sm:$0xff] %v1447_v51  }
 0x324   : > { %1453 = vst [vmem:[%s370_s12 + $0x10] sm:$0xff] %v1442_v53  }
 0x325   : > { %1854 = shalt.err (!%p1851_p3)
}
 0x326   : > { %s1855_s9 = scalar_lea.hbm %s2241_s17, 512  ;;  %s1859_s20 = scalar_lea.hbm %s2295_s8, 1024 }
 0x327   : > { %p1856_p5 = scmp.ne.s32.totalorder %s2241_s17, %s1855_s9  ;;  %p1860_p12 = scmp.lt.u32.totalorder %s2241_s17, %s2295_s8 }
 0x328   : > { %p1861_p8 = scmp.lt.u32.totalorder %s1859_s20, %s1855_s9  ;;  %p1863_p13 = scmp.lt.u32.totalorder %s1855_s9, %s2241_s17 }
 0x329   : > { %p1857_p10 = pnand %p1856_p5, %p2317_p7 }
 0x32a   : > { %p1862_p11 = por %p1861_p8, %p1860_p12 }
 0x32b   : > { %p1858_p4 = pneg %p1857_p10 }
 0x32c   : > { %p1864_p1 = por %p1863_p13, %p1862_p11 }
 0x32e   : > { %p1865_p6 = pnand %p1864_p1, %p1858_p4 }
 0x330   : > { %1868 = shalt.err (!%p1865_p6)
}
 0x331   : > { %1620 = dma.vmem_to_hbm [thread:$0]  (%p2317_p7), %s2234_s21, 512, %s2241_s17, %s1140_s14, %s1924_s10, %s1924_s10, %s1925_s16  }
 0x332 PF: > { %s2318_s24 = sld [smem:[#allocation18_spill]]  ;;  %p1646_p9 = scmp.ge.s32.totalorder %s1915_s30, 2 }
 0x333   : > { %s1184_s11 = sand.u32 1, %s1903_s27  }
 0x334   : > { %s1185_s23 = scalar_lea.sflag [#allocation4], %s1184_s11 }
 0x338   : > { %p2319_p2 = scmp.ne.s32.totalorder %s2318_s24, 0 }
 0x33a   : > { %p1634_p0 = pnand %p1646_p9, %p2319_p2 }
 0x33c   : > { %1894 = dma.done.wait (!%p1634_p0), %s1185_s23, 512  }
 0x33d   : > { %1896 = vsyncadd (!%p1634_p0), %s1185_s23, 4294966784  ;;  %s1194_s15 = scalar_lea.sflag [#allocation10], %s1184_s11 }
 0x33e   : > { %1898 = dma.done.wait (!%p1634_p0), %s1194_s15, 512  }
 0x33f   : > { %1900 = vsyncadd (!%p1634_p0), %s1194_s15, 4294966784  ;;  %s2320_s30 = sld [smem:[#allocation16_spill]]  ;;  %s2321_s29 = sld [smem:[#allocation15_spill]] }
 0x340   : > { %s2322_s25 = sld [smem:[#allocation17_spill]]  ;;  %s2323_s27 = smov %s1907_s28 }
 0x345   : > { %p24_p7 = scmp.ge.s32.totalorder %s2320_s30, 4   ;;  %s2324_s28 = smov %s2321_s29 }
 0x346   : > { %s2325_s29 = smov %s2322_s25 }
 0x347   :  { %26 = sbr.rel (!%p24_p7) target bundleno = 7 (0x7), region = 117 }
 0x34e   :  { %1199 = vsyncpa [#allocation3], 1 }
 0x34f   :  { %1201 = vsyncpa [#allocation3 + $0x1], 1 }
 0x350   :  { %1202 = vsyncpa [#allocation6], 1 }
 0x351   :  { %1203 = vsyncpa [#allocation4], 1 }
 0x352   :  { %1205 = vsyncpa [#allocation4 + $0x1], 1 }
 0x353   :  { %1206 = vsyncpa [#allocation10], 1 }
 0x354   :  { %1208 = vsyncpa [#allocation10 + $0x1], 1 }

// kernel: tpu_custom_call.1
= control target key start
LH: loop header
LB: loop body
LE: loop exit
PB: predicated region body
PF: predicated region fallthrough
CT: control target
= control target key end

     0   :  { %14 = vsyncpa [#allocation3], 0  ;;  %s2287_s0 = inlined_call_operand.vmem [shape: bf16[128,128], index: 0, kind: input, shape index: {}]   ;;  %s2288_s1 = inlined_call_operand.vmem [shape: f32[128,1], index: 1, kind: input, shape index: {}]   ;;  %s2289_s2 = inlined_call_operand.vmem [shape: bf16[128,128], index: 2, kind: input, shape index: {}]   ;;  %s2290_s3 = inlined_call_operand.hbm [shape: bf16[128,128], index: 3, kind: input, shape index: {}]   ;;  %s2291_s4 = inlined_call_operand.hbm [shape: bf16[128,128], index: 4, kind: input, shape index: {}]   ;;  %s2292_s5 = inlined_call_operand.vmem [shape: f32[1,128], index: 5, kind: input, shape index: {}]   ;;  %s2293_s6 = inlined_call_operand.hbm [shape: bf16[128,128], index: 6, kind: input, shape index: {}]   ;;  %s2294_s7 = inlined_call_operand.hbm [shape: bf16[128,128], index: 7, kind: output, shape index: {0}]   ;;  %s2295_s8 = inlined_call_operand.hbm [shape: bf16[128,128], index: 8, kind: output, shape index: {1}]  }
   0x1   :  { %15 = vsyncpa [#allocation6], 0 }
   0x2   :  { %16 = vsyncpa [#allocation4], 0 }
   0x3   :  { %18 = vsyncpa [#allocation4 + $0x1], 0 }
   0x4   :  { %19 = vsyncpa [#allocation10], 0 }
   0x5   :  { %21 = vsyncpa [#allocation10 + $0x1], 0  ;;  %s1972_s27 = smov 0   ;;  %s1974_s28 = smov 0  }
   0x6   :  { %s1976_s29 = smov 0   ;;  %s1978_s30 = smov 0  }
   0x7 LB: > { %2303 = sst [smem:[#allocation15_spill]] %s1911_s29  ;;  %s1993_s9 = sadd.s32 4294967295, %s1915_s30   ;;  %s1915_s30 = sphi %s1978_s30, %s2320_s30   ;;  %s1911_s29 = sphi %s1976_s29, %s2325_s29   ;;  %s1907_s28 = sphi %s1974_s28, %s2324_s28   ;;  %s1903_s27 = sphi %s1972_s27, %s2323_s27  }
   0x8   : > { %s1308_s10 = sadd.s32 4294967294, %s1915_s30   ;;  %s1997_s11 = sadd.s32 1, %s1915_s30  }
   0x9   : > { %2304 = sst [smem:[#allocation16_spill]] %s1997_s11  ;;  %s191_s12 = sadd.s32 1, %s1911_s29 }
   0xa   : > { %s188_s13 = ssub.s32 %s1915_s30, %s1997_s11  ;;  %p201_p0 = scmp.ne.s32.totalorder %s1911_s29, %s1907_s28 }
   0xb   : > { %p189_p1 = scmp.eq.s32.totalorder %s188_s13, 0  ;;  %p202_p2 = scmp.eq.s32.totalorder %s1993_s9, 1 }
   0xc   : > { %p207_p3 = scmp.ne.s32.totalorder %s1907_s28, %s1903_s27  ;;  %p208_p4 = scmp.eq.s32.totalorder %s1308_s10, 1 }
   0xd   : > { %s2008_s14 = scalar_select %p189_p1, %s1911_s29, %s191_s12  }
   0xe   : > { %p2010_p5 = por %p202_p2, %p201_p0  ;;  %p2014_p6 = por %p208_p4, %p207_p3 }
   0xf   : > { %2305 = sst [smem:[#allocation17_spill]] %s2008_s14  ;;  %p1309_p7 = scmp.ge.s32.totalorder %s1915_s30, 1 }
  0x10   : > { %s2306_s15 = scalar_select %p2010_p5, 1, 0 }
  0x11   : > { %s2307_s16 = scalar_select %p2014_p6, 1, 0 }
  0x12   : > { %p241_p8 = scmp.lt.s32.totalorder %s1915_s30, 3  ;;  %p2296_p9 = scmp.eq.s32.totalorder %s1993_s9, 0 }
  0x13   : > { %2308 = sst [smem:[#allocation18_spill]] %s2307_s16  ;;  %s1917_s18 = smov [#allocation5]  }
  0x14   : > { %p2021_p10 = pnand %p1309_p7, %p241_p8  ;;  %s269_s19 = sshll.u32 %s1917_s18, 4  ;;  %s2027_s19 = int_to_ptr.vmem [resolvable:$true] %s269_s19 }
  0x15   : > { %s1918_s21 = smov [#allocation2]   ;;  %s1919_s23 = smov [#allocation7]  }
  0x16   : > { %s2309_s17 = scalar_select %p2021_p10, 1, 0 }
  0x17   : > { %p1623_p11 = pneg %p2021_p10  ;;  %s256_s22 = sshll.u32 %s1918_s21, 4  ;;  %s2035_s22 = int_to_ptr.vmem [resolvable:$true] %s256_s22 }
  0x18   : > { %s2037_s24 = sshll.u32 %s1919_s23, 4  ;;  %s1729_s10 = scalar_lea.hbm %s2291_s4, 1024  ;;  %s286_s24 = int_to_ptr.vmem [resolvable:$true] %s2037_s24 }
  0x19   : > { %p2031_p12 = pnand %p2296_p9, %p1623_p11  ;;  %p1730_p13 = scmp.ne.s32.totalorder %s2291_s4, %s1729_s10 }
  0x1a   : > { %p1736_p3 = scmp.lt.u32.totalorder %s1729_s10, %s2291_s4 }
  0x1b   : > { %p2047_p0 = pneg %p2031_p12 }
  0x1d   : > { %p1732_p1 = pnand %p2047_p0, %p1730_p13 }
  0x1f   : > { %p1733_p2 = pneg %p1732_p1 }
  0x21   : > { %p1738_p4 = pnand %p1736_p3, %p1733_p2 }
  0x23   : > { %1741 = shalt.err (!%p1738_p4)
}
  0x24   : > { %s1742_s25 = scalar_lea.vmem %s2027_s19, 1024  ;;  %p1750_p9 = scmp.lt.s32.totalorder %s2027_s19, %s2027_s19 }
  0x25   : > { %p1743_p7 = scmp.ne.s32.totalorder %s2027_s19, %s1742_s25  ;;  %p1751_p6 = scmp.lt.s32.totalorder %s1742_s25, %s1742_s25 }
  0x27   : > { %p1745_p8 = pnand %p1743_p7, %p2047_p0  ;;  %p1752_p13 = por %p1751_p6, %p1750_p9 }
  0x29   : > { %p1746_p11 = pneg %p1745_p8 }
  0x2b   : > { %p1753_p1 = pnand %p1752_p13, %p1746_p11 }
  0x2d   : > { %1756 = shalt.err (!%p1753_p1)
}
  0x2e   : > { %s1920_s26 = smov 64   ;;  %s1921_s10 = smov 4  }
  0x2f   : > { %1629 = dma.hbm_to_vmem [thread:$0]  (!%p2031_p12), %s2291_s4, 1024, %s2027_s19, [#allocation6], %s1920_s26, %s1920_s26, %s1921_s10  }
  0x30   : > { %s1757_s25 = scalar_lea.hbm %s2290_s3, 1024 }
  0x31   : > { %p1758_p6 = scmp.ne.s32.totalorder %s2290_s3, %s1757_s25  ;;  %p1764_p3 = scmp.lt.u32.totalorder %s1757_s25, %s2290_s3 }
  0x33   : > { %p1760_p9 = pnand %p1758_p6, %p2047_p0 }
  0x35   : > { %p1761_p2 = pneg %p1760_p9 }
  0x37   : > { %p1766_p4 = pnand %p1764_p3, %p1761_p2 }
  0x39   : > { %1769 = shalt.err (!%p1766_p4)
}
  0x3a   : > { %s1770_s19 = scalar_lea.vmem %s2035_s22, 1024  ;;  %p1778_p13 = scmp.lt.s32.totalorder %s2035_s22, %s2035_s22 }
  0x3b   : > { %p1771_p7 = scmp.ne.s32.totalorder %s2035_s22, %s1770_s19  ;;  %p1779_p1 = scmp.lt.s32.totalorder %s1770_s19, %s1770_s19 }
  0x3d   : > { %p1773_p8 = pnand %p1771_p7, %p2047_p0  ;;  %p1780_p6 = por %p1779_p1, %p1778_p13 }
  0x3f   : > { %p1774_p11 = pneg %p1773_p8 }
  0x41   : > { %p1781_p9 = pnand %p1780_p6, %p1774_p11 }
  0x43   : > { %1784 = shalt.err (!%p1781_p9)
}
  0x44   : > { %1626 = dma.hbm_to_vmem [thread:$0]  (!%p2031_p12), %s2290_s3, 1024, %s2035_s22, [#allocation3], %s1920_s26, %s1920_s26, %s1921_s10  }
  0x45   : > { %s1785_s12 = scalar_lea.hbm %s2293_s6, 1024 }
  0x46   : > { %p1786_p2 = scmp.ne.s32.totalorder %s2293_s6, %s1785_s12  ;;  %p1792_p7 = scmp.lt.u32.totalorder %s1785_s12, %s2293_s6 }
  0x48   : > { %p1788_p3 = pnand %p1786_p2, %p2047_p0 }
  0x4a   : > { %p1789_p4 = pneg %p1788_p3 }
  0x4c   : > { %p1794_p8 = pnand %p1792_p7, %p1789_p4 }
  0x4e   : > { %1797 = shalt.err (!%p1794_p8)
}
  0x4f   : > { %s1798_s19 = scalar_lea.vmem %s286_s24, 1024  ;;  %p1806_p6 = scmp.lt.s32.totalorder %s286_s24, %s286_s24 }
  0x50   : > { %p1799_p11 = scmp.ne.s32.totalorder %s286_s24, %s1798_s19  ;;  %p1807_p9 = scmp.lt.s32.totalorder %s1798_s19, %s1798_s19 }
  0x52   : > { %p1801_p13 = pnand %p1799_p11, %p2047_p0  ;;  %p1808_p5 = por %p1807_p9, %p1806_p6 }
  0x54   : > { %p1802_p1 = pneg %p1801_p13 }
  0x56   : > { %p1809_p10 = pnand %p1808_p5, %p1802_p1 }
  0x58   : > { %1812 = shalt.err (!%p1809_p10)
}
  0x59   : > { %1632 = dma.hbm_to_vmem [thread:$0]  (!%p2031_p12), %s2293_s6, 1024, %s286_s24, [#allocation6], %s1920_s26, %s1920_s26, %s1921_s10  }
  0x5a   : > { %p2312_p2 = scmp.ne.s32.totalorder %s2309_s17, 0 }
  0x5b   : > { %p2313_p0 = scmp.eq.s32.totalorder (!%p2312_p2), %s1993_s9, 0 }
  0x5c   : > { %319 = sbr.rel (%p2312_p2) target bundleno = 818 (0x332), region = 48 }
  0x63   : > { %1886 = dma.done.wait (%p2313_p0), [#allocation3], 1024   ;;  %p2314_p3 = pmov %p2313_p0 }
  0x64   : > { %p2315_p5 = pmov %p2313_p0 }
  0x65   : > { %1888 = vsyncadd (%p2314_p3), [#allocation3], 4294966272 }
  0x66   : > { %1890 = dma.done.wait (%p2315_p5), [#allocation6], 2048   ;;  %p2316_p10 = pmov %p2313_p0 }
  0x67   : > { %s1320_s20 = sshll.u32 %s1993_s9, 3  ;;  %v1922_v0 = vmov 0   ;;  %v1689_v1 = vld [vmem:[%s2289_s2] sm:$0xff]   ;;  %v1690_v2 = vld [vmem:[%s2289_s2 + $0x8] sm:$0xff]   ;;  %v1691_v3 = vld [vmem:[%s2289_s2 + $0x10] sm:$0xff]   ;;  %s1336_s17 = sshll.u32 %s1993_s9, 6 }
  0x68   : > { %1892 = vsyncadd (%p2316_p10), [#allocation6], 4294965248  ;;  %p372_p4 = scmp.lt.s32.totalorder %s1320_s20, 15  ;;  %1687 = vset.pattern.permute.xlu0 %v1922_v0  ;;  %1688 = vset.pattern.permute.xlu1 %v1922_v0  ;;  %v1692_v4 = vld [vmem:[%s2289_s2 + $0x18] sm:$0xff]   ;;  %v1693_v6 = vld [vmem:[%s2289_s2 + $0x20] sm:$0xff]   ;;  %s1407_s18 = sshll.u32 %s1993_s9, 9 }
  0x69   : > { %1503 = vmatprep.subr.bf16.mxu0 %v1689_v1  ;;  %v1694_v9 = vld [vmem:[%s2289_s2 + $0x28] sm:$0xff]   ;;  %v1701_v12 = vld [vmem:[#allocation5] sm:$0xff]   ;;  %v1695_v16 = vld [vmem:[%s2289_s2 + $0x30] sm:$0xff]   ;;  %p2317_p7 = scmp.ne.s32.totalorder %s2306_s15, 0  ;;  %s1923_s12 = smov [#allocation8]  }
  0x6a   : > { %s2327_s20 = smov (!%p372_p4, %s1320_s20), 15  ;;  %1504 = vmatpush3.bf16.msra.mxu0 %v1689_v1  ;;  %v1702_v13 = vld [vmem:[#allocation5 + $0x8] sm:$0xff]   ;;  %1527 = vmatprep.subr.bf16.mxu1 %v1701_v12  ;;  %v1703_v17 = vld [vmem:[#allocation5 + $0x10] sm:$0xff]   ;;  %v1696_v19 = vld [vmem:[%s2289_s2 + $0x38] sm:$0xff]  }
  0x6b   : > { %s1321_s10 = sshll.u32 %s2327_s20, 2  ;;  %1505 = vmatprep.subr.bf16.mxu0 %v1690_v2  ;;  %s1323_s21 = sshll.u32 %s2327_s20, 3  ;;  %1528 = vmatpush3.bf16.msra.mxu1 %v1701_v12  ;;  %v1704_v22 = vld [vmem:[#allocation5 + $0x18] sm:$0xff]   ;;  %v1705_v24 = vld [vmem:[#allocation5 + $0x20] sm:$0xff]   ;;  %v1706_v26 = vld [vmem:[#allocation5 + $0x28] sm:$0xff]  }
  0x6c   : > { %s2142_s13 = scalar_lea.vmem %s2287_s0, %s1321_s10  ;;  %s2151_s29 = scalar_lea.vmem %s2288_s1, %s1323_s21  ;;  %1529 = vmatprep.subr.bf16.mxu1 %v1702_v13  ;;  %v1707_v27 = vld [vmem:[#allocation5 + $0x30] sm:$0xff]   ;;  %v1708_v29 = vld [vmem:[#allocation5 + $0x38] sm:$0xff]   ;;  %v1710_v30 = vld [vmem:[#allocation2] sm:$0xff]  }
  0x6d   : > { %v1697_v5 = vld [vmem:[%s2142_s13] sm:$0xff]   ;;  %v388_v8 = vld [vmem:[%s2151_s29 + $0x10] sm:$0xff]  ;;  %v387_v10 = vld [vmem:[%s2151_s29 + $0x8] sm:$0xff]  ;;  %s604_s10 = sshra.s32 %s1336_s17, 3  ;;  %s1817_s21 = sshll.u32 %s1923_s12, 4  ;;  %s1818_s21 = int_to_ptr.vmem [resolvable:$false] %s1817_s21 }
  0x6e   : > { %1506 = vmatpush3.bf16.msra.mxu0 %v1690_v2  ;;  %1519 = vmatprep.mubr.bf16.mxu0 %v1697_v5  ;;  %v386_v7 = vld [vmem:[%s2151_s29] sm:$0xff]  ;;  %v389_v11 = vld [vmem:[%s2151_s29 + $0x18] sm:$0xff]  ;;  %s1337_s11 = sshll.u32 %s604_s10, 2  ;;  %v391_v15 = vld [vmem:[%s2151_s29 + $0x28] sm:$0xff] }
  0x6f   : > { %1507 = vmatprep.subr.bf16.mxu0 %v1691_v3  ;;  %557 = vperm.xlu0 %1687, %v386_v7   ;;  %v390_v14 = vld [vmem:[%s2151_s29 + $0x20] sm:$0xff]  ;;  %s2172_s23 = scalar_lea.vmem %s2289_s2, %s1337_s11  ;;  %v392_v18 = vld [vmem:[%s2151_s29 + $0x30] sm:$0xff]  ;;  %v393_v20 = vld [vmem:[%s2151_s29 + $0x38] sm:$0xff]  ;;  %s2190_s29 = sand.u32 1, %s1907_s28  }
  0x70   : > { %567 = vperm.xlu1 %1688, %v388_v8   ;;  %1530 = vmatpush3.bf16.msra.mxu1 %v1702_v13  ;;  %v1709_v21 = vld [vmem:[%s2172_s23] sm:$0xff]   ;;  %v1698_v23 = vld [vmem:[%s2142_s13 + $0x8] sm:$0xff]   ;;  %v1699_v25 = vld [vmem:[%s2142_s13 + $0x10] sm:$0xff]   ;;  %s1318_s17 = sshll.u32 %s2190_s29, 5  ;;  %s2203_s11 = scalar_lea.hbm %s2294_s7, %s1407_s18 }
  0x71   : > { %1531 = vmatprep.subr.bf16.mxu1 %v1703_v17  ;;  %1543 = vmatprep.mubr.bf16.mxu1 %v1709_v21  ;;  %v1700_v28 = vld [vmem:[%s2142_s13 + $0x18] sm:$0xff]   ;;  %v1711_v31 = vld [vmem:[%s2172_s23 + $0x8] sm:$0xff]   ;;  %v1713_v33 = vld [vmem:[#allocation2 + $0x10] sm:$0xff]   ;;  %s363_s20 = scalar_lea.vmem [#allocation8], %s1318_s17  ;;  %s1135_s14 = scalar_lea.sflag [#allocation4], %s2190_s29 }
  0x72   : > { %1508 = vmatpush3.bf16.msra.mxu0 %v1691_v3  ;;  %v1712_v32 = vld [vmem:[#allocation2 + $0x8] sm:$0xff]   ;;  %v1714_v34 = vld [vmem:[#allocation2 + $0x18] sm:$0xff]   ;;  %v1715_v35 = vld [vmem:[#allocation2 + $0x20] sm:$0xff]   ;;  %s1153_s24 = sshll.u32 %s363_s20, 4  ;;  %s2195_s24 = int_to_ptr.vmem [resolvable:$true] %s1153_s24 }
  0x73   : > { %1509 = vmatprep.subr.bf16.mxu0 %v1692_v4  ;;  %562 = vperm.xlu0 %1687, %v387_v10   ;;  %v1716_v36 = vld [vmem:[#allocation2 + $0x28] sm:$0xff]   ;;  %v1717_v37 = vld [vmem:[%s2172_s23 + $0x10] sm:$0xff]   ;;  %v1718_v38 = vld [vmem:[%s2172_s23 + $0x18] sm:$0xff]   ;;  %s1813_s16 = scalar_lea.vmem %s2195_s24, 512  ;;  %s1819_s23 = scalar_lea.vmem %s1818_s21, 1024 }
  0x74   : > { %572 = vperm.xlu1 %1688, %v389_v11   ;;  %1532 = vmatpush3.bf16.msra.mxu1 %v1703_v17  ;;  %v1719_v39 = vld [vmem:[#allocation2 + $0x30] sm:$0xff]   ;;  %v1720_v40 = vld [vmem:[#allocation2 + $0x38] sm:$0xff]   ;;  %v1721_v41 = vld [vmem:[#allocation7] sm:$0xff]   ;;  %p1814_p12 = scmp.ne.s32.totalorder %s2195_s24, %s1813_s16  ;;  %p1820_p13 = scmp.lt.s32.totalorder %s2195_s24, %s1818_s21 }
  0x75   : > { %1533 = vmatprep.subr.bf16.mxu1 %v1704_v22  ;;  %v1722_v42 = vld [vmem:[#allocation7 + $0x8] sm:$0xff]   ;;  %v1723_v43 = vld [vmem:[#allocation7 + $0x10] sm:$0xff]   ;;  %v1724_v44 = vld [vmem:[#allocation7 + $0x18] sm:$0xff]   ;;  %p1821_p1 = scmp.lt.s32.totalorder %s1819_s23, %s1813_s16 }
  0x76   : > { %1510 = vmatpush3.bf16.msra.mxu0 %v1692_v4  ;;  %v1725_v45 = vld [vmem:[#allocation7 + $0x20] sm:$0xff]   ;;  %v1726_v46 = vld [vmem:[#allocation7 + $0x28] sm:$0xff]   ;;  %v1727_v11 = vld [vmem:[#allocation7 + $0x30] sm:$0xff]   ;;  %p1815_p8 = pnand %p1814_p12, %p2317_p7 }
  0x77   : > { %1511 = vmatprep.subr.bf16.mxu0 %v1693_v6  ;;  %577 = vperm.xlu0 %1687, %v390_v14   ;;  %v1728_v12 = vld [vmem:[#allocation7 + $0x38] sm:$0xff]   ;;  %v1358_v13 = vld [vmem:[%s2292_s5] ss:$0 sm:$0xff]  ;;  %p1822_p6 = por %p1821_p1, %p1820_p13 }
  0x78   : > { %582 = vperm.xlu1 %1688, %v391_v15   ;;  %1534 = vmatpush3.bf16.msra.mxu1 %v1704_v22  ;;  %p1816_p11 = pneg %p1815_p8 }
  0x79   : > { %1535 = vmatprep.subr.bf16.mxu1 %v1705_v24 }
  0x7a   : > { %1512 = vmatpush3.bf16.msra.mxu0 %v1693_v6  ;;  %p1823_p9 = pnand %p1822_p6, %p1816_p11 }
  0x7b   : > { %1513 = vmatprep.subr.bf16.mxu0 %v1694_v9  ;;  %587 = vperm.xlu0 %1687, %v392_v18  }
  0x7c   : > { %592 = vperm.xlu1 %1688, %v393_v20   ;;  %1536 = vmatpush3.bf16.msra.mxu1 %v1705_v24 }
  0x7d   : > { %1537 = vmatprep.subr.bf16.mxu1 %v1706_v26 }
  0x7e   : > { %1514 = vmatpush3.bf16.msra.mxu0 %v1694_v9 }
  0x7f   : > { %1515 = vmatprep.subr.bf16.mxu0 %v1695_v16 }
  0x80   : > { %1538 = vmatpush3.bf16.msra.mxu1 %v1706_v26 }
  0x81   : > { %1539 = vmatprep.subr.bf16.mxu1 %v1707_v27 }
  0x82   : > { %1516 = vmatpush3.bf16.msra.mxu0 %v1695_v16 }
  0x83   : > { %1517 = vmatprep.subr.bf16.mxu0 %v1696_v19 }
  0x84   : > { %1540 = vmatpush3.bf16.msra.mxu1 %v1707_v27 }
  0x85   : > { %1541 = vmatprep.subr.bf16.mxu1 %v1708_v29 }
  0x86   : > { %1518 = vmatpush3.bf16.msra.mxu0 %v1696_v19 }
  0x87   : > { %1575 = vmatprep.subr.bf16.mxu0 %v1721_v41 }
  0x88   : > { %1542 = vmatpush3.bf16.msra.mxu1 %v1708_v29 }
  0x89   : > { %1520 = vmatmul.mubr.bf16.vlgmr.msra.gmra.mrb[0].mxu0 %v1698_v23  ;;  %1551 = vmatprep.subr.bf16.mxu1 %v1710_v30 }
  0x8a   : > { %1523 = vmatprep.mubr.bf16.mxu0 %v1699_v25  ;;  %1576 = vmatpush3.bf16.msra.mxu0 %v1721_v41 }
  0x8b   : > { %1544 = vmatmul.mubr.bf16.vlgmr.msra.gmra.mrb[0].mxu1 %v1711_v31  ;;  %1577 = vmatprep.subr.bf16.mxu0 %v1722_v42 }
  0x8c   : > { %1552 = vmatpush3.bf16.msra.mxu1 %v1710_v30  ;;  %1547 = vmatprep.mubr.bf16.mxu1 %v1717_v37 }
  0x8d   : > { %1553 = vmatprep.subr.bf16.mxu1 %v1712_v32 }
  0x8e   : > { %1578 = vmatpush3.bf16.msra.mxu0 %v1722_v42 }
  0x8f   : > { %1579 = vmatprep.subr.bf16.mxu0 %v1723_v43 }
  0x90   : > { %1554 = vmatpush3.bf16.msra.mxu1 %v1712_v32 }
  0x91   : > { %1524 = vmatmul.mubr.bf16.gmra.mrb[4].mxu0 %v1700_v28  ;;  %1555 = vmatprep.subr.bf16.mxu1 %v1713_v33 }
  0x92   : > { %1580 = vmatpush3.bf16.msra.mxu0 %v1723_v43 }
  0x93   : > { %1548 = vmatmul.mubr.bf16.gmra.mrb[4].mxu1 %v1718_v38  ;;  %1581 = vmatprep.subr.bf16.mxu0 %v1724_v44 }
  0x94   : > { %1556 = vmatpush3.bf16.msra.mxu1 %v1713_v33 }
  0x95   : > { %1557 = vmatprep.subr.bf16.mxu1 %v1714_v34 }
  0x96   : > { %1582 = vmatpush3.bf16.msra.mxu0 %v1724_v44 }
  0x97   : > { %1583 = vmatprep.subr.bf16.mxu0 %v1725_v45 }
  0x98   : > { %1558 = vmatpush3.bf16.msra.mxu1 %v1714_v34 }
  0x99   : > { %1559 = vmatprep.subr.bf16.mxu1 %v1715_v35 }
  0x9a   : > { %1584 = vmatpush3.bf16.msra.mxu0 %v1725_v45 }
  0x9b   : > { %1585 = vmatprep.subr.bf16.mxu0 %v1726_v46 }
  0x9c   : > { %1560 = vmatpush3.bf16.msra.mxu1 %v1715_v35 }
  0x9d   : > { %1561 = vmatprep.subr.bf16.mxu1 %v1716_v36 }
  0x9e   : > { %1586 = vmatpush3.bf16.msra.mxu0 %v1726_v46 }
  0x9f   : > { %1587 = vmatprep.subr.bf16.mxu0 %v1727_v11 }
  0xa0   : > { %1562 = vmatpush3.bf16.msra.mxu1 %v1716_v36 }
  0xa1   : > { %1563 = vmatprep.subr.bf16.mxu1 %v1719_v39 }
  0xa2   : > { %1588 = vmatpush3.bf16.msra.mxu0 %v1727_v11 }
  0xa3   : > { %1589 = vmatprep.subr.bf16.mxu0 %v1728_v12 }
  0xa4   : > { %1564 = vmatpush3.bf16.msra.mxu1 %v1719_v39 }
  0xa5   : > { %1565 = vmatprep.subr.bf16.mxu1 %v1720_v40 }
  0xa6   : > { %1590 = vmatpush3.bf16.msra.mxu0 %v1728_v12 }
  0xa8   : > { %1566 = vmatpush3.bf16.msra.mxu1 %v1720_v40 }
  0xee   : > { %v558_v47 = vpop.permute.xlu0 %557 }
  0xef   : > { %v568_v48 = vpop.permute.xlu1 %567 }
  0xf2   : > { %v563_v49 = vpop.permute.xlu0 %562 }
  0xf3   : > { %v573_v50 = vpop.permute.xlu1 %572 }
  0xf6   : > { %v578_v54 = vpop.permute.xlu0 %577 }
  0xf7   : > { %v583_v58 = vpop.permute.xlu1 %582 }
  0xfa   : > { %v588_v0 = vpop.permute.xlu0 %587 }
  0xfb   : > { %v593_v2 = vpop.permute.xlu1 %592 }
 0x15c   : > { %v1521_v51 = vpop.f32.mrb[0].mxu0 }
 0x15d   : > { %v524_v52 = vpop.f32.mrb[1].mxu0  ;;  %v597_v55 = vmul.f32 %v1521_v51, %v568_v48 }
 0x15e   : > { %v1522_v53 = vpop.f32.mrb[2].mxu0  ;;  %v595_v59 = vmul.f32 %v558_v47, %v524_v52 }
 0x15f   : > { %v598_v56 = vmul.f32 %v1522_v53, %v573_v50  ;;  %v527_v57 = vpop.f32.mrb[3].mxu0 }
 0x160   : > { %v596_v60 = vmul.f32 %v563_v49, %v527_v57 }
 0x161   : > { %v617_v61 = vpack.c.bf16 %v598_v56, %v597_v55 }
 0x162   : > { %v616_v62 = vpack.c.bf16 %v596_v60, %v595_v59 }
 0x164   : > { %v1525_v63 = vpop.f32.mrb[4].mxu0  ;;  %1567 = vmatprep.mubr.bf16.mxu1 %v616_v62 }
 0x165   : > { %v540_v1 = vpop.f32.mrb[5].mxu0  ;;  %1568 = vmatmul.mubr.bf16.vlgmr.msra.gmra.mrb[0].mxu1 %v617_v61  ;;  %v601_v4 = vmul.f32 %v1525_v63, %v588_v0 }
 0x166   : > { %v1526_v3 = vpop.f32.mrb[6].mxu0  ;;  %v599_v7 = vmul.f32 %v578_v54, %v540_v1 }
 0x167   : > { %v602_v5 = vmul.f32 %v1526_v3, %v593_v2  ;;  %v543_v6 = vpop.f32.mrb[7].mxu0 }
 0x168   : > { %v600_v8 = vmul.f32 %v583_v58, %v543_v6 }
 0x169   : > { %v619_v9 = vpack.c.bf16 %v602_v5, %v601_v4 }
 0x16a   : > { %v618_v10 = vpack.c.bf16 %v600_v8, %v599_v7 }
 0x16c   : > { %1571 = vmatprep.mubr.bf16.mxu1 %v618_v10 }
 0x16d   : > { %1572 = vmatmul.mubr.bf16.gmra.mrb[4].mxu1 %v619_v9 }
 0x238   : > { %v1569_v14 = vpop.f32.mrb[0].mxu1 }
 0x239   : > { %v911_v15 = vadd.f32 %v1569_v14, %v1358_v13  ;;  %v871_v16 = vpop.f32.mrb[1].mxu1 }
 0x23a   : > { %v909_v17 = vadd.f32 %v1358_v13, %v871_v16  ;;  %v1570_v18 = vpop.f32.mrb[2].mxu1 }
 0x23b   : > { %v912_v19 = vadd.f32 %v1570_v18, %v1358_v13  ;;  %v874_v20 = vpop.f32.mrb[3].mxu1  ;;  %v919_v22 = vmax.f32 %v911_v15, 0.0 }
 0x23c   : > { %v910_v21 = vadd.f32 %v1358_v13, %v874_v20  ;;  %v917_v24 = vmax.f32 %v909_v17, 0.0 }
 0x23d   : > { %v920_v23 = vmax.f32 %v912_v19, 0.0 }
 0x23e   : > { %v918_v25 = vmax.f32 %v910_v21, 0.0 }
 0x23f   : > { %v926_v26 = vpack.c.bf16 %v920_v23, %v919_v22 }
 0x240   : > { %v925_v27 = vpack.c.bf16 %v918_v25, %v917_v24  ;;  %v1573_v28 = vpop.f32.mrb[4].mxu1 }
 0x241   : > { %1449 = vst [vmem:[%s363_s20 + $0x8] sm:$0xff] %v926_v26   ;;  %v915_v29 = vadd.f32 %v1573_v28, %v1358_v13  ;;  %v887_v30 = vpop.f32.mrb[5].mxu1 }
 0x242   : > { %1413 = vst [vmem:[%s363_s20] sm:$0xff] %v925_v27   ;;  %v913_v31 = vadd.f32 %v1358_v13, %v887_v30  ;;  %v1574_v32 = vpop.f32.mrb[6].mxu1  ;;  %1591 = vmatprep.mubr.bf16.mxu0 %v925_v27 }
 0x243   : > { %v916_v33 = vadd.f32 %v1574_v32, %v1358_v13  ;;  %v890_v34 = vpop.f32.mrb[7].mxu1  ;;  %1592 = vmatmul.mubr.bf16.vlgmr.msra.gmra.mrb[8].mxu0 %v926_v26  ;;  %v923_v36 = vmax.f32 %v915_v29, 0.0 }
 0x244   : > { %v914_v35 = vadd.f32 %v1358_v13, %v890_v34  ;;  %v921_v38 = vmax.f32 %v913_v31, 0.0 }
 0x245   : > { %v924_v37 = vmax.f32 %v916_v33, 0.0 }
 0x246   : > { %v922_v39 = vmax.f32 %v914_v35, 0.0 }
 0x247   : > { %v928_v40 = vpack.c.bf16 %v924_v37, %v923_v36 }
 0x248   : > { %v927_v41 = vpack.c.bf16 %v922_v39, %v921_v38 }
 0x249   : > { %1451 = vst [vmem:[%s363_s20 + $0x18] sm:$0xff] %v928_v40  }
 0x24a   : > { %1450 = vst [vmem:[%s363_s20 + $0x10] sm:$0xff] %v927_v41   ;;  %1595 = vmatprep.mubr.bf16.mxu0 %v927_v41 }
 0x24b   : > { %1596 = vmatmul.mubr.bf16.gmra.mrb[12].mxu0 %v928_v40 }
 0x24c   : > { %1826 = shalt.err (!%p1823_p9)
}
 0x24d   : > { %s1827_s25 = scalar_lea.hbm %s2203_s11, 512  ;;  %s1831_s22 = scalar_lea.hbm %s2294_s7, 1024 }
 0x24e   : > { %p1828_p2 = scmp.ne.s32.totalorder %s2203_s11, %s1827_s25  ;;  %p1832_p5 = scmp.lt.u32.totalorder %s2203_s11, %s2294_s7 }
 0x24f   : > { %p1833_p10 = scmp.lt.u32.totalorder %s1831_s22, %s1827_s25  ;;  %p1835_p12 = scmp.lt.u32.totalorder %s1827_s25, %s2203_s11 }
 0x250   : > { %p1829_p0 = pnand %p1828_p2, %p2317_p7 }
 0x251   : > { %p1834_p4 = por %p1833_p10, %p1832_p5 }
 0x252   : > { %p1830_p3 = pneg %p1829_p0 }
 0x253   : > { %p1836_p8 = por %p1835_p12, %p1834_p4 }
 0x255   : > { %p1837_p11 = pnand %p1836_p8, %p1830_p3 }
 0x257   : > { %1840 = shalt.err (!%p1837_p11)
}
 0x258   : > { %s1924_s10 = smov 64   ;;  %s1925_s16 = smov 4  }
 0x259   : > { %1619 = dma.vmem_to_hbm [thread:$0]  (%p2317_p7), %s2195_s24, 512, %s2203_s11, %s1135_s14, %s1924_s10, %s1924_s10, %s1925_s16  }
 0x25a   : > { %s370_s12 = scalar_lea.vmem [#allocation9], %s1318_s17  ;;  %s2241_s17 = scalar_lea.hbm %s2295_s8, %s1407_s18 }
 0x25b   : > { %s1169_s21 = sshll.u32 %s370_s12, 4  ;;  %s1140_s14 = scalar_lea.sflag [#allocation10], %s2190_s29  ;;  %s2234_s21 = int_to_ptr.vmem [resolvable:$true] %s1169_s21 }
 0x25c   : > { %s1841_s23 = scalar_lea.vmem %s2234_s21, 512  ;;  %s1926_s25 = smov [#allocation9]  }
 0x25d   : > { %p1842_p13 = scmp.ne.s32.totalorder %s2234_s21, %s1841_s23  ;;  %s1845_s19 = sshll.u32 %s1926_s25, 4  ;;  %s1846_s19 = int_to_ptr.vmem [resolvable:$false] %s1845_s19 }
 0x25e   : > { %s1847_s13 = scalar_lea.vmem %s1846_s19, 1024  ;;  %p1848_p9 = scmp.lt.s32.totalorder %s2234_s21, %s1846_s19 }
 0x25f   : > { %p1843_p1 = pnand %p1842_p13, %p2317_p7  ;;  %p1849_p2 = scmp.lt.s32.totalorder %s1847_s13, %s1841_s23 }
 0x261   : > { %p1844_p6 = pneg %p1843_p1  ;;  %p1850_p0 = por %p1849_p2, %p1848_p9 }
 0x263   : > { %p1851_p3 = pnand %p1850_p0, %p1844_p6 }
 0x316   : > { %v1593_v42 = vpop.f32.mrb[8].mxu0 }
 0x317   : > { %v1063_v43 = vpop.f32.mrb[9].mxu0 }
 0x318   : > { %v1594_v44 = vpop.f32.mrb[10].mxu0 }
 0x319   : > { %v1437_v45 = vpack.c.bf16 %v1594_v44, %v1593_v42  ;;  %v1066_v46 = vpop.f32.mrb[11].mxu0 }
 0x31a   : > { %v1432_v47 = vpack.c.bf16 %v1066_v46, %v1063_v43 }
 0x31b   : > { %1452 = vst [vmem:[%s370_s12 + $0x8] sm:$0xff] %v1437_v45  }
 0x31c   : > { %1433 = vst [vmem:[%s370_s12] sm:$0xff] %v1432_v47  }
 0x31e   : > { %v1597_v48 = vpop.f32.mrb[12].mxu0 }
 0x31f   : > { %v1079_v49 = vpop.f32.mrb[13].mxu0 }
 0x320   : > { %v1598_v50 = vpop.f32.mrb[14].mxu0 }
 0x321   : > { %v1447_v51 = vpack.c.bf16 %v1598_v50, %v1597_v48  ;;  %v1082_v52 = vpop.f32.mrb[15].mxu0 }
 0x322   : > { %v1442_v53 = vpack.c.bf16 %v1082_v52, %v1079_v49 }
 0x323   : > { %1454 = vst [vmem:[%s370_s12 + $0x18] sm:$0xff] %v1447_v51  }
 0x324   : > { %1453 = vst [vmem:[%s370_s12 + $0x10] sm:$0xff] %v1442_v53  }
 0x325   : > { %1854 = shalt.err (!%p1851_p3)
}
 0x326   : > { %s1855_s9 = scalar_lea.hbm %s2241_s17, 512  ;;  %s1859_s20 = scalar_lea.hbm %s2295_s8, 1024 }
 0x327   : > { %p1856_p5 = scmp.ne.s32.totalorder %s2241_s17, %s1855_s9  ;;  %p1860_p12 = scmp.lt.u32.totalorder %s2241_s17, %s2295_s8 }
 0x328   : > { %p1861_p8 = scmp.lt.u32.totalorder %s1859_s20, %s1855_s9  ;;  %p1863_p13 = scmp.lt.u32.totalorder %s1855_s9, %s2241_s17 }
 0x329   : > { %p1857_p10 = pnand %p1856_p5, %p2317_p7 }
 0x32a   : > { %p1862_p11 = por %p1861_p8, %p1860_p12 }
 0x32b   : > { %p1858_p4 = pneg %p1857_p10 }
 0x32c   : > { %p1864_p1 = por %p1863_p13, %p1862_p11 }
 0x32e   : > { %p1865_p6 = pnand %p1864_p1, %p1858_p4 }
 0x330   : > { %1868 = shalt.err (!%p1865_p6)
}
 0x331   : > { %1620 = dma.vmem_to_hbm [thread:$0]  (%p2317_p7), %s2234_s21, 512, %s2241_s17, %s1140_s14, %s1924_s10, %s1924_s10, %s1925_s16  }
 0x332 PF: > { %s2318_s24 = sld [smem:[#allocation18_spill]]  ;;  %p1646_p9 = scmp.ge.s32.totalorder %s1915_s30, 2 }
 0x333   : > { %s1184_s11 = sand.u32 1, %s1903_s27  }
 0x334   : > { %s1185_s23 = scalar_lea.sflag [#allocation4], %s1184_s11 }
 0x338   : > { %p2319_p2 = scmp.ne.s32.totalorder %s2318_s24, 0 }
 0x33a   : > { %p1634_p0 = pnand %p1646_p9, %p2319_p2 }
 0x33c   : > { %1894 = dma.done.wait (!%p1634_p0), %s1185_s23, 512  }
 0x33d   : > { %1896 = vsyncadd (!%p1634_p0), %s1185_s23, 4294966784  ;;  %s1194_s15 = scalar_lea.sflag [#allocation10], %s1184_s11 }
 0x33e   : > { %1898 = dma.done.wait (!%p1634_p0), %s1194_s15, 512  }
 0x33f   : > { %1900 = vsyncadd (!%p1634_p0), %s1194_s15, 4294966784  ;;  %s2320_s30 = sld [smem:[#allocation16_spill]]  ;;  %s2321_s29 = sld [smem:[#allocation15_spill]] }
 0x340   : > { %s2322_s25 = sld [smem:[#allocation17_spill]]  ;;  %s2323_s27 = smov %s1907_s28 }
 0x345   : > { %p24_p7 = scmp.ge.s32.totalorder %s2320_s30, 4   ;;  %s2324_s28 = smov %s2321_s29 }
 0x346   : > { %s2325_s29 = smov %s2322_s25 }
 0x347   :  { %26 = sbr.rel (!%p24_p7) target bundleno = 7 (0x7), region = 117 }
 0x34e   :  { %1199 = vsyncpa [#allocation3], 1 }
 0x34f   :  { %1201 = vsyncpa [#allocation3 + $0x1], 1 }
 0x350   :  { %1202 = vsyncpa [#allocation6], 1 }
 0x351   :  { %1203 = vsyncpa [#allocation4], 1 }
 0x352   :  { %1205 = vsyncpa [#allocation4 + $0x1], 1 }
 0x353   :  { %1206 = vsyncpa [#allocation10], 1 }
 0x354   :  { %1208 = vsyncpa [#allocation10 + $0x1], 1 }

</bundles_post_ra>
